<compile_context>
chip_gen: v7x
topology: tpu7x:2x2x1
jax: 0.10.0
libtpu: 0.0.40
codegen_flags: <defaults>
</compile_context>

<pallas_src>
import functools

import jax
import jax.numpy as jnp
from jax.experimental import pallas as pl
from jax.experimental.pallas import tpu as pltpu

BN_EPS = 1e-5

_CONV_CFG = [
    # (in_ch, out_ch, kh, kw, stride)
    (5, 8, 50, 5, 5),
    (8, 16, 1, 3, 1),
    (16, 32, 1, 3, 1),
    (32, 32, 1, 3, 1),
    (32, 32, 1, 4, 1),
]
_NUM_FEATURES = 8
_OUT_CHANNELS = 128


# ---------------------------------------------------------------------------
# Fused Pallas kernel: conv stack + BN(+ReLU) + MLP head, all in VMEM.
# ---------------------------------------------------------------------------
def _fused_cnn_kernel(B, W1, tail_kws, tail_wvalid,
                      cols_ref,
                      w1_ref, g1_ref, be1_ref,
                      w2_ref, g2_ref, be2_ref,
                      w3_ref, g3_ref, be3_ref,
                      w4_ref, g4_ref, be4_ref,
                      w5_ref, g5_ref, be5_ref,
                      lw1_ref, lb1_ref, lw2_ref, lb2_ref,
                      o_ref):
    def bn_relu(y, g_ref, be_ref, w_valid):
        """Training-mode BatchNorm (batch stats over valid rows) + ReLU."""
        n = y.shape[0]
        if w_valid == W1 and n == B * W1:
            # Every row is a valid (b, ow) position — unmasked statistics.
            count = float(n)
            mean = jnp.sum(y, axis=0, keepdims=True) / count
            diff = y - mean
            var = jnp.sum(diff * diff, axis=0, keepdims=True) / count
        else:
            # Rows r with (r % W1) >= w_valid are padding; exclude from stats.
            rows = jax.lax.broadcasted_iota(jnp.int32, (n, 1), 0)
            mask = ((rows % W1) < w_valid).astype(jnp.float32)
            count = float(B * w_valid)
            mean = jnp.sum(y * mask, axis=0, keepdims=True) / count
            diff = (y - mean) * mask
            var = jnp.sum(diff * diff, axis=0, keepdims=True) / count
        scale = g_ref[...] * jax.lax.rsqrt(var + BN_EPS)
        shift = be_ref[...] - mean * scale
        return jnp.maximum(y * scale + shift, 0.0)

    # ---- Layer 1: (50x5, stride 5) conv as an im2col matmul.
    # Conv bias omitted: it cancels exactly under training-mode BatchNorm.
    y = jnp.dot(cols_ref[...], w1_ref[...], preferred_element_type=jnp.float32)
    h = bn_relu(y, g1_ref, be1_ref, W1)                       # (B*W1, 8)

    # ---- Layers 2-5: 1xk stride-1 convs as sums of shifted matmuls.
    tail = ((w2_ref, g2_ref, be2_ref), (w3_ref, g3_ref, be3_ref),
            (w4_ref, g4_ref, be4_ref), (w5_ref, g5_ref, be5_ref))
    for (w_ref, g_ref, be_ref), kw, wv in zip(tail, tail_kws, tail_wvalid):
        n_out = h.shape[0] - (kw - 1)
        c_out = w_ref.shape[2]
        acc = jnp.zeros((n_out, c_out), jnp.float32)
        for dw in range(kw):                                  # static unroll
            acc = acc + jnp.dot(h[dw:dw + n_out, :], w_ref[dw],
                                preferred_element_type=jnp.float32)
        h = bn_relu(acc, g_ref, be_ref, wv)

    # ---- MLP head (Linear -> ReLU -> Linear) on the whole slab.
    # Only rows b*W1 correspond to the flattened (B, 32) conv output; the
    # extra rows are negligible padding work that stays in VMEM.
    hid = jnp.dot(h, lw1_ref[...], preferred_element_type=jnp.float32) + lb1_ref[...]
    hid = jnp.maximum(hid, 0.0)
    out_full = jnp.dot(hid, lw2_ref[...], preferred_element_type=jnp.float32) + lb2_ref[...]
    for b in range(B):
        o_ref[b:b + 1, :] = out_full[b * W1:b * W1 + 1, :]


def _full_spec(shape):
    nd = len(shape)
    return pl.BlockSpec(shape, lambda i, _nd=nd: (0,) * _nd)


# ---------------------------------------------------------------------------
# Parameters (matching the PyTorch module's parameter shapes)
# ---------------------------------------------------------------------------
def init_params(key):
    params = {"conv": [], "lin": {}}
    for (cin, cout, kh, kw, _s) in _CONV_CFG:
        key, k1, k2, k3, k4 = jax.random.split(key, 5)
        fan_in = cin * kh * kw
        scale = 1.0 / jnp.sqrt(jnp.float32(fan_in))
        params["conv"].append({
            "w": jax.random.normal(k1, (cout, cin, kh, kw), jnp.float32) * scale,
            # Conv bias exists in the PyTorch module but cancels under
            # training-mode BN, so it is never passed to the kernel.
            "b": jax.random.normal(k2, (cout,), jnp.float32) * scale,
            "gamma": 1.0 + 0.1 * jax.random.normal(k3, (cout,), jnp.float32),
            "beta": 0.1 * jax.random.normal(k4, (cout,), jnp.float32),
        })
    d_in = _NUM_FEATURES * 4  # 32 = flattened conv output (C * 1 * 1)
    key, k1, k2, k3, k4 = jax.random.split(key, 5)
    params["lin"] = {
        "w1": jax.random.normal(k1, (_OUT_CHANNELS, d_in), jnp.float32)
        / jnp.sqrt(jnp.float32(d_in)),
        "b1": jax.random.normal(k2, (_OUT_CHANNELS,), jnp.float32) * 0.01,
        "w2": jax.random.normal(k3, (_OUT_CHANNELS, _OUT_CHANNELS), jnp.float32)
        / jnp.sqrt(jnp.float32(_OUT_CHANNELS)),
        "b2": jax.random.normal(k4, (_OUT_CHANNELS,), jnp.float32) * 0.01,
    }
    return params


# ---------------------------------------------------------------------------
# Forward: one reshape/transpose of glue, then a single fused pallas_call.
# ---------------------------------------------------------------------------
@jax.jit
def cnn_forward(params, x):
    """x: (B, 5, H, W) NCHW (PyTorch convention). Returns (B, 128)."""
    B, cin, H, W = x.shape
    cin0, c1, kh1, kw1, s1 = _CONV_CFG[0]
    assert cin == cin0 and H == kh1 and kw1 == s1  # OH == 1, windows tile W

    # Layer-1 im2col: kw == stride ⇒ non-overlapping windows ⇒ pure
    # reshape/transpose (column order (C_in, KH, KW) matches PyTorch flatten).
    ow1 = (W - kw1) // s1 + 1
    xr = x[:, :, :, :ow1 * s1].reshape(B, cin, H, ow1, kw1)
    cols1 = xr.transpose(0, 3, 1, 2, 4).reshape(B * ow1, cin * H * kw1)

    conv = params["conv"]
    w1t = conv[0]["w"].reshape(c1, cin * kh1 * kw1).T          # (1250, 8)
    g1 = conv[0]["gamma"].reshape(1, c1)
    be1 = conv[0]["beta"].reshape(1, c1)

    tail_args, tail_kws, tail_wvalid = [], [], []
    wv = ow1
    for (ci, co, _kh, kw, _s), p in zip(_CONV_CFG[1:], conv[1:]):
        wv = wv - kw + 1
        tail_kws.append(kw)
        tail_wvalid.append(wv)
        wt = p["w"].reshape(co, ci, kw).transpose(2, 1, 0)     # (kw, C_in, C_out)
        tail_args += [wt, p["gamma"].reshape(1, co), p["beta"].reshape(1, co)]
    assert wv == 1  # conv stack collapses to width 1 (flatten gives (B, 32))

    lin = params["lin"]
    lw1t = lin["w1"].T                    # (32, 128)
    lb1 = lin["b1"].reshape(1, -1)
    lw2t = lin["w2"].T                    # (128, 128)
    lb2 = lin["b2"].reshape(1, -1)

    args = [cols1, w1t, g1, be1] + tail_args + [lw1t, lb1, lw2t, lb2]

    kernel = functools.partial(_fused_cnn_kernel, B, ow1,
                               tuple(tail_kws), tuple(tail_wvalid))
    return pl.pallas_call(
        kernel,
        grid=(1,),
        in_specs=[_full_spec(a.shape) for a in args],
        out_specs=_full_spec((B, _OUT_CHANNELS)),
        out_shape=jax.ShapeDtypeStruct((B, _OUT_CHANNELS), jnp.float32),
        compiler_params=pltpu.CompilerParams(
            dimension_semantics=("arbitrary",)),
    )(*args)


if __name__ == "__main__":
    key = jax.random.PRNGKey(0)
    pkey, xkey = jax.random.split(key)
    params = init_params(pkey)

    # Smallest valid input: H = 50 (kernel height), W = 50 gives conv widths
    # 10 -> 8 -> 6 -> 4 -> 1, so the stack collapses to (B, 32, 1, 1).
    x = jax.random.normal(xkey, (2, 5, 50, 50), jnp.float32)

    out = jax.block_until_ready(cnn_forward(params, x))
    assert out.shape == (2, 128), out.shape
    assert out.dtype == jnp.float32
    assert bool(jnp.all(jnp.isfinite(out)))
    print("KERNEL_OK")
</pallas_src>

<mosaic_0001>
module attributes {stable_mosaic.version = 11 : i64} {
  func.func @_fused_cnn_kernel(%arg0: i32, %arg1: memref<20x1250xf32, #tpu.memory_space<vmem>>, %arg2: memref<1250x8xf32, #tpu.memory_space<vmem>>, %arg3: memref<1x8xf32, #tpu.memory_space<vmem>>, %arg4: memref<1x8xf32, #tpu.memory_space<vmem>>, %arg5: memref<3x8x16xf32, #tpu.memory_space<vmem>>, %arg6: memref<1x16xf32, #tpu.memory_space<vmem>>, %arg7: memref<1x16xf32, #tpu.memory_space<vmem>>, %arg8: memref<3x16x32xf32, #tpu.memory_space<vmem>>, %arg9: memref<1x32xf32, #tpu.memory_space<vmem>>, %arg10: memref<1x32xf32, #tpu.memory_space<vmem>>, %arg11: memref<3x32x32xf32, #tpu.memory_space<vmem>>, %arg12: memref<1x32xf32, #tpu.memory_space<vmem>>, %arg13: memref<1x32xf32, #tpu.memory_space<vmem>>, %arg14: memref<4x32x32xf32, #tpu.memory_space<vmem>>, %arg15: memref<1x32xf32, #tpu.memory_space<vmem>>, %arg16: memref<1x32xf32, #tpu.memory_space<vmem>>, %arg17: memref<32x128xf32, #tpu.memory_space<vmem>>, %arg18: memref<1x128xf32, #tpu.memory_space<vmem>>, %arg19: memref<128x128xf32, #tpu.memory_space<vmem>>, %arg20: memref<1x128xf32, #tpu.memory_space<vmem>>, %arg21: memref<2x128xf32, #tpu.memory_space<vmem>>) attributes {dimension_semantics = [#tpu.dimension_semantics<arbitrary>], iteration_bounds = array<i64: 1>, scalar_prefetch = 0 : i64, scratch_operands = 0 : i64, tpu.core_type = #tpu.core_type<tc>, window_params = [{pipeline_mode = #tpu.pipeline_mode<synchronous>, transform_indices = @transform_0, window_bounds = array<i64: 20, 1250>}, {pipeline_mode = #tpu.pipeline_mode<synchronous>, transform_indices = @transform_1, window_bounds = array<i64: 1250, 8>}, {pipeline_mode = #tpu.pipeline_mode<synchronous>, transform_indices = @transform_2, window_bounds = array<i64: 1, 8>}, {pipeline_mode = #tpu.pipeline_mode<synchronous>, transform_indices = @transform_3, window_bounds = array<i64: 1, 8>}, {pipeline_mode = #tpu.pipeline_mode<synchronous>, transform_indices = @transform_4, window_bounds = array<i64: 3, 8, 16>}, {pipeline_mode = #tpu.pipeline_mode<synchronous>, transform_indices = @transform_5, window_bounds = array<i64: 1, 16>}, {pipeline_mode = #tpu.pipeline_mode<synchronous>, transform_indices = @transform_6, window_bounds = array<i64: 1, 16>}, {pipeline_mode = #tpu.pipeline_mode<synchronous>, transform_indices = @transform_7, window_bounds = array<i64: 3, 16, 32>}, {pipeline_mode = #tpu.pipeline_mode<synchronous>, transform_indices = @transform_8, window_bounds = array<i64: 1, 32>}, {pipeline_mode = #tpu.pipeline_mode<synchronous>, transform_indices = @transform_9, window_bounds = array<i64: 1, 32>}, {pipeline_mode = #tpu.pipeline_mode<synchronous>, transform_indices = @transform_10, window_bounds = array<i64: 3, 32, 32>}, {pipeline_mode = #tpu.pipeline_mode<synchronous>, transform_indices = @transform_11, window_bounds = array<i64: 1, 32>}, {pipeline_mode = #tpu.pipeline_mode<synchronous>, transform_indices = @transform_12, window_bounds = array<i64: 1, 32>}, {pipeline_mode = #tpu.pipeline_mode<synchronous>, transform_indices = @transform_13, window_bounds = array<i64: 4, 32, 32>}, {pipeline_mode = #tpu.pipeline_mode<synchronous>, transform_indices = @transform_14, window_bounds = array<i64: 1, 32>}, {pipeline_mode = #tpu.pipeline_mode<synchronous>, transform_indices = @transform_15, window_bounds = array<i64: 1, 32>}, {pipeline_mode = #tpu.pipeline_mode<synchronous>, transform_indices = @transform_16, window_bounds = array<i64: 32, 128>}, {pipeline_mode = #tpu.pipeline_mode<synchronous>, transform_indices = @transform_17, window_bounds = array<i64: 1, 128>}, {pipeline_mode = #tpu.pipeline_mode<synchronous>, transform_indices = @transform_18, window_bounds = array<i64: 128, 128>}, {pipeline_mode = #tpu.pipeline_mode<synchronous>, transform_indices = @transform_19, window_bounds = array<i64: 1, 128>}, {pipeline_mode = #tpu.pipeline_mode<synchronous>, transform_indices = @transform_20, window_bounds = array<i64: 2, 128>}]} {
    %c0 = arith.constant 0 : index
    %c0_0 = arith.constant 0 : index
    %0 = vector.load %arg1[%c0, %c0_0] : memref<20x1250xf32, #tpu.memory_space<vmem>>, vector<20x1250xf32>
    %c0_1 = arith.constant 0 : index
    %c0_2 = arith.constant 0 : index
    %1 = vector.load %arg2[%c0_1, %c0_2] : memref<1250x8xf32, #tpu.memory_space<vmem>>, vector<1250x8xf32>
    %cst = arith.constant dense<0.000000e+00> : vector<20x8xf32>
    %2 = tpu.matmul %0, %1, %cst {dimension_numbers = #tpu.dot_dimension_numbers<[1], [0], [0], [1], [0, 0, 1, 1], [], []>} : vector<20x1250xf32>, vector<1250x8xf32>, vector<20x8xf32> -> vector<20x8xf32>
    %cst_3 = arith.constant dense<0.000000e+00> : vector<8xf32>
    %3 = vector.multi_reduction <add>, %2, %cst_3 [0] : vector<20x8xf32> to vector<8xf32>
    %4 = vector.shape_cast %3 : vector<8xf32> to vector<1x8xf32>
    %cst_4 = arith.constant 2.000000e+01 : f32
    %5 = vector.broadcast %cst_4 : f32 to vector<1x8xf32>
    %6 = arith.divf %4, %5 : vector<1x8xf32>
    %7 = vector.broadcast %6 : vector<1x8xf32> to vector<20x8xf32>
    %8 = arith.subf %2, %7 : vector<20x8xf32>
    %9 = arith.mulf %8, %8 : vector<20x8xf32>
    %cst_5 = arith.constant dense<0.000000e+00> : vector<8xf32>
    %10 = vector.multi_reduction <add>, %9, %cst_5 [0] : vector<20x8xf32> to vector<8xf32>
    %11 = vector.shape_cast %10 : vector<8xf32> to vector<1x8xf32>
    %cst_6 = arith.constant 2.000000e+01 : f32
    %12 = vector.broadcast %cst_6 : f32 to vector<1x8xf32>
    %13 = arith.divf %11, %12 : vector<1x8xf32>
    %c0_7 = arith.constant 0 : index
    %c0_8 = arith.constant 0 : index
    %14 = vector.load %arg3[%c0_7, %c0_8] : memref<1x8xf32, #tpu.memory_space<vmem>>, vector<1x8xf32>
    %cst_9 = arith.constant 9.99999974E-6 : f32
    %15 = vector.broadcast %cst_9 : f32 to vector<1x8xf32>
    %16 = arith.addf %13, %15 : vector<1x8xf32>
    %17 = math.rsqrt %16 : vector<1x8xf32>
    %18 = arith.mulf %14, %17 : vector<1x8xf32>
    %c0_10 = arith.constant 0 : index
    %c0_11 = arith.constant 0 : index
    %19 = vector.load %arg4[%c0_10, %c0_11] : memref<1x8xf32, #tpu.memory_space<vmem>>, vector<1x8xf32>
    %20 = arith.mulf %6, %18 : vector<1x8xf32>
    %21 = arith.subf %19, %20 : vector<1x8xf32>
    %22 = vector.broadcast %18 : vector<1x8xf32> to vector<20x8xf32>
    %23 = arith.mulf %2, %22 : vector<20x8xf32>
    %24 = vector.broadcast %21 : vector<1x8xf32> to vector<20x8xf32>
    %25 = arith.addf %23, %24 : vector<20x8xf32>
    %cst_12 = arith.constant 0.000000e+00 : f32
    %26 = vector.broadcast %cst_12 : f32 to vector<20x8xf32>
    %27 = arith.maximumf %25, %26 : vector<20x8xf32>
    %cst_13 = arith.constant 0.000000e+00 : f32
    %28 = vector.broadcast %cst_13 : f32 to vector<18x16xf32>
    %29 = vector.extract_strided_slice %27 {offsets = [0, 0], sizes = [18, 8], strides = [1, 1]} : vector<20x8xf32> to vector<18x8xf32>
    %c0_14 = arith.constant 0 : index
    %c0_15 = arith.constant 0 : index
    %c0_16 = arith.constant 0 : index
    %30 = vector.load %arg5[%c0_14, %c0_15, %c0_16] : memref<3x8x16xf32, #tpu.memory_space<vmem>>, vector<1x8x16xf32>
    %31 = vector.shape_cast %30 : vector<1x8x16xf32> to vector<8x16xf32>
    %cst_17 = arith.constant dense<0.000000e+00> : vector<18x16xf32>
    %32 = tpu.matmul %29, %31, %cst_17 {dimension_numbers = #tpu.dot_dimension_numbers<[1], [0], [0], [1], [0, 0, 1, 1], [], []>} : vector<18x8xf32>, vector<8x16xf32>, vector<18x16xf32> -> vector<18x16xf32>
    %33 = arith.addf %28, %32 : vector<18x16xf32>
    %34 = vector.extract_strided_slice %27 {offsets = [1, 0], sizes = [18, 8], strides = [1, 1]} : vector<20x8xf32> to vector<18x8xf32>
    %c1 = arith.constant 1 : index
    %c0_18 = arith.constant 0 : index
    %c0_19 = arith.constant 0 : index
    %35 = vector.load %arg5[%c1, %c0_18, %c0_19] : memref<3x8x16xf32, #tpu.memory_space<vmem>>, vector<1x8x16xf32>
    %36 = vector.shape_cast %35 : vector<1x8x16xf32> to vector<8x16xf32>
    %cst_20 = arith.constant dense<0.000000e+00> : vector<18x16xf32>
    %37 = tpu.matmul %34, %36, %cst_20 {dimension_numbers = #tpu.dot_dimension_numbers<[1], [0], [0], [1], [0, 0, 1, 1], [], []>} : vector<18x8xf32>, vector<8x16xf32>, vector<18x16xf32> -> vector<18x16xf32>
    %38 = arith.addf %33, %37 : vector<18x16xf32>
    %39 = vector.extract_strided_slice %27 {offsets = [2, 0], sizes = [18, 8], strides = [1, 1]} : vector<20x8xf32> to vector<18x8xf32>
    %c2 = arith.constant 2 : index
    %c0_21 = arith.constant 0 : index
    %c0_22 = arith.constant 0 : index
    %40 = vector.load %arg5[%c2, %c0_21, %c0_22] : memref<3x8x16xf32, #tpu.memory_space<vmem>>, vector<1x8x16xf32>
    %41 = vector.shape_cast %40 : vector<1x8x16xf32> to vector<8x16xf32>
    %cst_23 = arith.constant dense<0.000000e+00> : vector<18x16xf32>
    %42 = tpu.matmul %39, %41, %cst_23 {dimension_numbers = #tpu.dot_dimension_numbers<[1], [0], [0], [1], [0, 0, 1, 1], [], []>} : vector<18x8xf32>, vector<8x16xf32>, vector<18x16xf32> -> vector<18x16xf32>
    %43 = arith.addf %38, %42 : vector<18x16xf32>
    %44 = tpu.iota {dimensions = array<i32: 0>} : vector<18x1xi32>
    %c10_i32 = arith.constant 10 : i32
    %c0_i32 = arith.constant 0 : i32
    %45 = arith.cmpi eq, %c10_i32, %c0_i32 : i32
    %c1_i32 = arith.constant 1 : i32
    %46 = arith.select %45, %c1_i32, %c10_i32 : i32
    %47 = vector.broadcast %46 : i32 to vector<18x1xi32>
    %48 = arith.remsi %44, %47 : vector<18x1xi32>
    %c0_i32_24 = arith.constant 0 : i32
    %49 = vector.broadcast %c0_i32_24 : i32 to vector<18x1xi32>
    %50 = arith.cmpi ne, %48, %49 : vector<18x1xi32>
    %c0_i32_25 = arith.constant 0 : i32
    %51 = vector.broadcast %c0_i32_25 : i32 to vector<18x1xi32>
    %52 = arith.cmpi slt, %48, %51 : vector<18x1xi32>
    %c0_i32_26 = arith.constant 0 : i32
    %53 = arith.cmpi slt, %46, %c0_i32_26 : i32
    %54 = vector.broadcast %53 : i1 to vector<18x1xi1>
    %55 = vector.broadcast %54 : vector<18x1xi1> to vector<18x1xi1>
    %56 = arith.xori %52, %55 : vector<18x1xi1>
    %57 = arith.andi %56, %50 : vector<18x1xi1>
    %58 = vector.broadcast %46 : i32 to vector<18x1xi32>
    %59 = arith.addi %48, %58 : vector<18x1xi32>
    %60 = arith.select %57, %59, %48 : vector<18x1xi1>, vector<18x1xi32>
    %c8_i32 = arith.constant 8 : i32
    %61 = vector.broadcast %c8_i32 : i32 to vector<18x1xi32>
    %62 = arith.cmpi slt, %60, %61 : vector<18x1xi32>
    %63 = arith.extui %62 : vector<18x1xi1> to vector<18x1xi32>
    %64 = arith.sitofp %63 : vector<18x1xi32> to vector<18x1xf32>
    %65 = vector.broadcast %64 : vector<18x1xf32> to vector<18x16xf32>
    %66 = arith.mulf %43, %65 : vector<18x16xf32>
    %cst_27 = arith.constant dense<0.000000e+00> : vector<16xf32>
    %67 = vector.multi_reduction <add>, %66, %cst_27 [0] : vector<18x16xf32> to vector<16xf32>
    %68 = vector.shape_cast %67 : vector<16xf32> to vector<1x16xf32>
    %cst_28 = arith.constant 1.600000e+01 : f32
    %69 = vector.broadcast %cst_28 : f32 to vector<1x16xf32>
    %70 = arith.divf %68, %69 : vector<1x16xf32>
    %71 = vector.broadcast %70 : vector<1x16xf32> to vector<18x16xf32>
    %72 = arith.subf %43, %71 : vector<18x16xf32>
    %73 = vector.broadcast %64 : vector<18x1xf32> to vector<18x16xf32>
    %74 = arith.mulf %72, %73 : vector<18x16xf32>
    %75 = arith.mulf %74, %74 : vector<18x16xf32>
    %cst_29 = arith.constant dense<0.000000e+00> : vector<16xf32>
    %76 = vector.multi_reduction <add>, %75, %cst_29 [0] : vector<18x16xf32> to vector<16xf32>
    %77 = vector.shape_cast %76 : vector<16xf32> to vector<1x16xf32>
    %cst_30 = arith.constant 1.600000e+01 : f32
    %78 = vector.broadcast %cst_30 : f32 to vector<1x16xf32>
    %79 = arith.divf %77, %78 : vector<1x16xf32>
    %c0_31 = arith.constant 0 : index
    %c0_32 = arith.constant 0 : index
    %80 = vector.load %arg6[%c0_31, %c0_32] : memref<1x16xf32, #tpu.memory_space<vmem>>, vector<1x16xf32>
    %cst_33 = arith.constant 9.99999974E-6 : f32
    %81 = vector.broadcast %cst_33 : f32 to vector<1x16xf32>
    %82 = arith.addf %79, %81 : vector<1x16xf32>
    %83 = math.rsqrt %82 : vector<1x16xf32>
    %84 = arith.mulf %80, %83 : vector<1x16xf32>
    %c0_34 = arith.constant 0 : index
    %c0_35 = arith.constant 0 : index
    %85 = vector.load %arg7[%c0_34, %c0_35] : memref<1x16xf32, #tpu.memory_space<vmem>>, vector<1x16xf32>
    %86 = arith.mulf %70, %84 : vector<1x16xf32>
    %87 = arith.subf %85, %86 : vector<1x16xf32>
    %88 = vector.broadcast %84 : vector<1x16xf32> to vector<18x16xf32>
    %89 = arith.mulf %43, %88 : vector<18x16xf32>
    %90 = vector.broadcast %87 : vector<1x16xf32> to vector<18x16xf32>
    %91 = arith.addf %89, %90 : vector<18x16xf32>
    %cst_36 = arith.constant 0.000000e+00 : f32
    %92 = vector.broadcast %cst_36 : f32 to vector<18x16xf32>
    %93 = arith.maximumf %91, %92 : vector<18x16xf32>
    %cst_37 = arith.constant 0.000000e+00 : f32
    %94 = vector.broadcast %cst_37 : f32 to vector<16x32xf32>
    %95 = vector.extract_strided_slice %93 {offsets = [0, 0], sizes = [16, 16], strides = [1, 1]} : vector<18x16xf32> to vector<16x16xf32>
    %c0_38 = arith.constant 0 : index
    %c0_39 = arith.constant 0 : index
    %c0_40 = arith.constant 0 : index
    %96 = vector.load %arg8[%c0_38, %c0_39, %c0_40] : memref<3x16x32xf32, #tpu.memory_space<vmem>>, vector<1x16x32xf32>
    %97 = vector.shape_cast %96 : vector<1x16x32xf32> to vector<16x32xf32>
    %cst_41 = arith.constant dense<0.000000e+00> : vector<16x32xf32>
    %98 = tpu.matmul %95, %97, %cst_41 {dimension_numbers = #tpu.dot_dimension_numbers<[1], [0], [0], [1], [0, 0, 1, 1], [], []>} : vector<16x16xf32>, vector<16x32xf32>, vector<16x32xf32> -> vector<16x32xf32>
    %99 = arith.addf %94, %98 : vector<16x32xf32>
    %100 = vector.extract_strided_slice %93 {offsets = [1, 0], sizes = [16, 16], strides = [1, 1]} : vector<18x16xf32> to vector<16x16xf32>
    %c1_42 = arith.constant 1 : index
    %c0_43 = arith.constant 0 : index
    %c0_44 = arith.constant 0 : index
    %101 = vector.load %arg8[%c1_42, %c0_43, %c0_44] : memref<3x16x32xf32, #tpu.memory_space<vmem>>, vector<1x16x32xf32>
    %102 = vector.shape_cast %101 : vector<1x16x32xf32> to vector<16x32xf32>
    %cst_45 = arith.constant dense<0.000000e+00> : vector<16x32xf32>
    %103 = tpu.matmul %100, %102, %cst_45 {dimension_numbers = #tpu.dot_dimension_numbers<[1], [0], [0], [1], [0, 0, 1, 1], [], []>} : vector<16x16xf32>, vector<16x32xf32>, vector<16x32xf32> -> vector<16x32xf32>
    %104 = arith.addf %99, %103 : vector<16x32xf32>
    %105 = vector.extract_strided_slice %93 {offsets = [2, 0], sizes = [16, 16], strides = [1, 1]} : vector<18x16xf32> to vector<16x16xf32>
    %c2_46 = arith.constant 2 : index
    %c0_47 = arith.constant 0 : index
    %c0_48 = arith.constant 0 : index
    %106 = vector.load %arg8[%c2_46, %c0_47, %c0_48] : memref<3x16x32xf32, #tpu.memory_space<vmem>>, vector<1x16x32xf32>
    %107 = vector.shape_cast %106 : vector<1x16x32xf32> to vector<16x32xf32>
    %cst_49 = arith.constant dense<0.000000e+00> : vector<16x32xf32>
    %108 = tpu.matmul %105, %107, %cst_49 {dimension_numbers = #tpu.dot_dimension_numbers<[1], [0], [0], [1], [0, 0, 1, 1], [], []>} : vector<16x16xf32>, vector<16x32xf32>, vector<16x32xf32> -> vector<16x32xf32>
    %109 = arith.addf %104, %108 : vector<16x32xf32>
    %110 = tpu.iota {dimensions = array<i32: 0>} : vector<16x1xi32>
    %c10_i32_50 = arith.constant 10 : i32
    %c0_i32_51 = arith.constant 0 : i32
    %111 = arith.cmpi eq, %c10_i32_50, %c0_i32_51 : i32
    %c1_i32_52 = arith.constant 1 : i32
    %112 = arith.select %111, %c1_i32_52, %c10_i32_50 : i32
    %113 = vector.broadcast %112 : i32 to vector<16x1xi32>
    %114 = arith.remsi %110, %113 : vector<16x1xi32>
    %c0_i32_53 = arith.constant 0 : i32
    %115 = vector.broadcast %c0_i32_53 : i32 to vector<16x1xi32>
    %116 = arith.cmpi ne, %114, %115 : vector<16x1xi32>
    %c0_i32_54 = arith.constant 0 : i32
    %117 = vector.broadcast %c0_i32_54 : i32 to vector<16x1xi32>
    %118 = arith.cmpi slt, %114, %117 : vector<16x1xi32>
    %c0_i32_55 = arith.constant 0 : i32
    %119 = arith.cmpi slt, %112, %c0_i32_55 : i32
    %120 = vector.broadcast %119 : i1 to vector<16x1xi1>
    %121 = vector.broadcast %120 : vector<16x1xi1> to vector<16x1xi1>
    %122 = arith.xori %118, %121 : vector<16x1xi1>
    %123 = arith.andi %122, %116 : vector<16x1xi1>
    %124 = vector.broadcast %112 : i32 to vector<16x1xi32>
    %125 = arith.addi %114, %124 : vector<16x1xi32>
    %126 = arith.select %123, %125, %114 : vector<16x1xi1>, vector<16x1xi32>
    %c6_i32 = arith.constant 6 : i32
    %127 = vector.broadcast %c6_i32 : i32 to vector<16x1xi32>
    %128 = arith.cmpi slt, %126, %127 : vector<16x1xi32>
    %129 = arith.extui %128 : vector<16x1xi1> to vector<16x1xi32>
    %130 = arith.sitofp %129 : vector<16x1xi32> to vector<16x1xf32>
    %131 = vector.broadcast %130 : vector<16x1xf32> to vector<16x32xf32>
    %132 = arith.mulf %109, %131 : vector<16x32xf32>
    %cst_56 = arith.constant dense<0.000000e+00> : vector<32xf32>
    %133 = vector.multi_reduction <add>, %132, %cst_56 [0] : vector<16x32xf32> to vector<32xf32>
    %134 = vector.shape_cast %133 : vector<32xf32> to vector<1x32xf32>
    %cst_57 = arith.constant 1.200000e+01 : f32
    %135 = vector.broadcast %cst_57 : f32 to vector<1x32xf32>
    %136 = arith.divf %134, %135 : vector<1x32xf32>
    %137 = vector.broadcast %136 : vector<1x32xf32> to vector<16x32xf32>
    %138 = arith.subf %109, %137 : vector<16x32xf32>
    %139 = vector.broadcast %130 : vector<16x1xf32> to vector<16x32xf32>
    %140 = arith.mulf %138, %139 : vector<16x32xf32>
    %141 = arith.mulf %140, %140 : vector<16x32xf32>
    %cst_58 = arith.constant dense<0.000000e+00> : vector<32xf32>
    %142 = vector.multi_reduction <add>, %141, %cst_58 [0] : vector<16x32xf32> to vector<32xf32>
    %143 = vector.shape_cast %142 : vector<32xf32> to vector<1x32xf32>
    %cst_59 = arith.constant 1.200000e+01 : f32
    %144 = vector.broadcast %cst_59 : f32 to vector<1x32xf32>
    %145 = arith.divf %143, %144 : vector<1x32xf32>
    %c0_60 = arith.constant 0 : index
    %c0_61 = arith.constant 0 : index
    %146 = vector.load %arg9[%c0_60, %c0_61] : memref<1x32xf32, #tpu.memory_space<vmem>>, vector<1x32xf32>
    %cst_62 = arith.constant 9.99999974E-6 : f32
    %147 = vector.broadcast %cst_62 : f32 to vector<1x32xf32>
    %148 = arith.addf %145, %147 : vector<1x32xf32>
    %149 = math.rsqrt %148 : vector<1x32xf32>
    %150 = arith.mulf %146, %149 : vector<1x32xf32>
    %c0_63 = arith.constant 0 : index
    %c0_64 = arith.constant 0 : index
    %151 = vector.load %arg10[%c0_63, %c0_64] : memref<1x32xf32, #tpu.memory_space<vmem>>, vector<1x32xf32>
    %152 = arith.mulf %136, %150 : vector<1x32xf32>
    %153 = arith.subf %151, %152 : vector<1x32xf32>
    %154 = vector.broadcast %150 : vector<1x32xf32> to vector<16x32xf32>
    %155 = arith.mulf %109, %154 : vector<16x32xf32>
    %156 = vector.broadcast %153 : vector<1x32xf32> to vector<16x32xf32>
    %157 = arith.addf %155, %156 : vector<16x32xf32>
    %cst_65 = arith.constant 0.000000e+00 : f32
    %158 = vector.broadcast %cst_65 : f32 to vector<16x32xf32>
    %159 = arith.maximumf %157, %158 : vector<16x32xf32>
    %cst_66 = arith.constant 0.000000e+00 : f32
    %160 = vector.broadcast %cst_66 : f32 to vector<14x32xf32>
    %161 = vector.extract_strided_slice %159 {offsets = [0, 0], sizes = [14, 32], strides = [1, 1]} : vector<16x32xf32> to vector<14x32xf32>
    %c0_67 = arith.constant 0 : index
    %c0_68 = arith.constant 0 : index
    %c0_69 = arith.constant 0 : index
    %162 = vector.load %arg11[%c0_67, %c0_68, %c0_69] : memref<3x32x32xf32, #tpu.memory_space<vmem>>, vector<1x32x32xf32>
    %163 = vector.shape_cast %162 : vector<1x32x32xf32> to vector<32x32xf32>
    %cst_70 = arith.constant dense<0.000000e+00> : vector<14x32xf32>
    %164 = tpu.matmul %161, %163, %cst_70 {dimension_numbers = #tpu.dot_dimension_numbers<[1], [0], [0], [1], [0, 0, 1, 1], [], []>} : vector<14x32xf32>, vector<32x32xf32>, vector<14x32xf32> -> vector<14x32xf32>
    %165 = arith.addf %160, %164 : vector<14x32xf32>
    %166 = vector.extract_strided_slice %159 {offsets = [1, 0], sizes = [14, 32], strides = [1, 1]} : vector<16x32xf32> to vector<14x32xf32>
    %c1_71 = arith.constant 1 : index
    %c0_72 = arith.constant 0 : index
    %c0_73 = arith.constant 0 : index
    %167 = vector.load %arg11[%c1_71, %c0_72, %c0_73] : memref<3x32x32xf32, #tpu.memory_space<vmem>>, vector<1x32x32xf32>
    %168 = vector.shape_cast %167 : vector<1x32x32xf32> to vector<32x32xf32>
    %cst_74 = arith.constant dense<0.000000e+00> : vector<14x32xf32>
    %169 = tpu.matmul %166, %168, %cst_74 {dimension_numbers = #tpu.dot_dimension_numbers<[1], [0], [0], [1], [0, 0, 1, 1], [], []>} : vector<14x32xf32>, vector<32x32xf32>, vector<14x32xf32> -> vector<14x32xf32>
    %170 = arith.addf %165, %169 : vector<14x32xf32>
    %171 = vector.extract_strided_slice %159 {offsets = [2, 0], sizes = [14, 32], strides = [1, 1]} : vector<16x32xf32> to vector<14x32xf32>
    %c2_75 = arith.constant 2 : index
    %c0_76 = arith.constant 0 : index
    %c0_77 = arith.constant 0 : index
    %172 = vector.load %arg11[%c2_75, %c0_76, %c0_77] : memref<3x32x32xf32, #tpu.memory_space<vmem>>, vector<1x32x32xf32>
    %173 = vector.shape_cast %172 : vector<1x32x32xf32> to vector<32x32xf32>
    %cst_78 = arith.constant dense<0.000000e+00> : vector<14x32xf32>
    %174 = tpu.matmul %171, %173, %cst_78 {dimension_numbers = #tpu.dot_dimension_numbers<[1], [0], [0], [1], [0, 0, 1, 1], [], []>} : vector<14x32xf32>, vector<32x32xf32>, vector<14x32xf32> -> vector<14x32xf32>
    %175 = arith.addf %170, %174 : vector<14x32xf32>
    %176 = tpu.iota {dimensions = array<i32: 0>} : vector<14x1xi32>
    %c10_i32_79 = arith.constant 10 : i32
    %c0_i32_80 = arith.constant 0 : i32
    %177 = arith.cmpi eq, %c10_i32_79, %c0_i32_80 : i32
    %c1_i32_81 = arith.constant 1 : i32
    %178 = arith.select %177, %c1_i32_81, %c10_i32_79 : i32
    %179 = vector.broadcast %178 : i32 to vector<14x1xi32>
    %180 = arith.remsi %176, %179 : vector<14x1xi32>
    %c0_i32_82 = arith.constant 0 : i32
    %181 = vector.broadcast %c0_i32_82 : i32 to vector<14x1xi32>
    %182 = arith.cmpi ne, %180, %181 : vector<14x1xi32>
    %c0_i32_83 = arith.constant 0 : i32
    %183 = vector.broadcast %c0_i32_83 : i32 to vector<14x1xi32>
    %184 = arith.cmpi slt, %180, %183 : vector<14x1xi32>
    %c0_i32_84 = arith.constant 0 : i32
    %185 = arith.cmpi slt, %178, %c0_i32_84 : i32
    %186 = vector.broadcast %185 : i1 to vector<14x1xi1>
    %187 = vector.broadcast %186 : vector<14x1xi1> to vector<14x1xi1>
    %188 = arith.xori %184, %187 : vector<14x1xi1>
    %189 = arith.andi %188, %182 : vector<14x1xi1>
    %190 = vector.broadcast %178 : i32 to vector<14x1xi32>
    %191 = arith.addi %180, %190 : vector<14x1xi32>
    %192 = arith.select %189, %191, %180 : vector<14x1xi1>, vector<14x1xi32>
    %c4_i32 = arith.constant 4 : i32
    %193 = vector.broadcast %c4_i32 : i32 to vector<14x1xi32>
    %194 = arith.cmpi slt, %192, %193 : vector<14x1xi32>
    %195 = arith.extui %194 : vector<14x1xi1> to vector<14x1xi32>
    %196 = arith.sitofp %195 : vector<14x1xi32> to vector<14x1xf32>
    %197 = vector.broadcast %196 : vector<14x1xf32> to vector<14x32xf32>
    %198 = arith.mulf %175, %197 : vector<14x32xf32>
    %cst_85 = arith.constant dense<0.000000e+00> : vector<32xf32>
    %199 = vector.multi_reduction <add>, %198, %cst_85 [0] : vector<14x32xf32> to vector<32xf32>
    %200 = vector.shape_cast %199 : vector<32xf32> to vector<1x32xf32>
    %cst_86 = arith.constant 8.000000e+00 : f32
    %201 = vector.broadcast %cst_86 : f32 to vector<1x32xf32>
    %202 = arith.divf %200, %201 : vector<1x32xf32>
    %203 = vector.broadcast %202 : vector<1x32xf32> to vector<14x32xf32>
    %204 = arith.subf %175, %203 : vector<14x32xf32>
    %205 = vector.broadcast %196 : vector<14x1xf32> to vector<14x32xf32>
    %206 = arith.mulf %204, %205 : vector<14x32xf32>
    %207 = arith.mulf %206, %206 : vector<14x32xf32>
    %cst_87 = arith.constant dense<0.000000e+00> : vector<32xf32>
    %208 = vector.multi_reduction <add>, %207, %cst_87 [0] : vector<14x32xf32> to vector<32xf32>
    %209 = vector.shape_cast %208 : vector<32xf32> to vector<1x32xf32>
    %cst_88 = arith.constant 8.000000e+00 : f32
    %210 = vector.broadcast %cst_88 : f32 to vector<1x32xf32>
    %211 = arith.divf %209, %210 : vector<1x32xf32>
    %c0_89 = arith.constant 0 : index
    %c0_90 = arith.constant 0 : index
    %212 = vector.load %arg12[%c0_89, %c0_90] : memref<1x32xf32, #tpu.memory_space<vmem>>, vector<1x32xf32>
    %cst_91 = arith.constant 9.99999974E-6 : f32
    %213 = vector.broadcast %cst_91 : f32 to vector<1x32xf32>
    %214 = arith.addf %211, %213 : vector<1x32xf32>
    %215 = math.rsqrt %214 : vector<1x32xf32>
    %216 = arith.mulf %212, %215 : vector<1x32xf32>
    %c0_92 = arith.constant 0 : index
    %c0_93 = arith.constant 0 : index
    %217 = vector.load %arg13[%c0_92, %c0_93] : memref<1x32xf32, #tpu.memory_space<vmem>>, vector<1x32xf32>
    %218 = arith.mulf %202, %216 : vector<1x32xf32>
    %219 = arith.subf %217, %218 : vector<1x32xf32>
    %220 = vector.broadcast %216 : vector<1x32xf32> to vector<14x32xf32>
    %221 = arith.mulf %175, %220 : vector<14x32xf32>
    %222 = vector.broadcast %219 : vector<1x32xf32> to vector<14x32xf32>
    %223 = arith.addf %221, %222 : vector<14x32xf32>
    %cst_94 = arith.constant 0.000000e+00 : f32
    %224 = vector.broadcast %cst_94 : f32 to vector<14x32xf32>
    %225 = arith.maximumf %223, %224 : vector<14x32xf32>
    %cst_95 = arith.constant 0.000000e+00 : f32
    %226 = vector.broadcast %cst_95 : f32 to vector<11x32xf32>
    %227 = vector.extract_strided_slice %225 {offsets = [0, 0], sizes = [11, 32], strides = [1, 1]} : vector<14x32xf32> to vector<11x32xf32>
    %c0_96 = arith.constant 0 : index
    %c0_97 = arith.constant 0 : index
    %c0_98 = arith.constant 0 : index
    %228 = vector.load %arg14[%c0_96, %c0_97, %c0_98] : memref<4x32x32xf32, #tpu.memory_space<vmem>>, vector<1x32x32xf32>
    %229 = vector.shape_cast %228 : vector<1x32x32xf32> to vector<32x32xf32>
    %cst_99 = arith.constant dense<0.000000e+00> : vector<11x32xf32>
    %230 = tpu.matmul %227, %229, %cst_99 {dimension_numbers = #tpu.dot_dimension_numbers<[1], [0], [0], [1], [0, 0, 1, 1], [], []>} : vector<11x32xf32>, vector<32x32xf32>, vector<11x32xf32> -> vector<11x32xf32>
    %231 = arith.addf %226, %230 : vector<11x32xf32>
    %232 = vector.extract_strided_slice %225 {offsets = [1, 0], sizes = [11, 32], strides = [1, 1]} : vector<14x32xf32> to vector<11x32xf32>
    %c1_100 = arith.constant 1 : index
    %c0_101 = arith.constant 0 : index
    %c0_102 = arith.constant 0 : index
    %233 = vector.load %arg14[%c1_100, %c0_101, %c0_102] : memref<4x32x32xf32, #tpu.memory_space<vmem>>, vector<1x32x32xf32>
    %234 = vector.shape_cast %233 : vector<1x32x32xf32> to vector<32x32xf32>
    %cst_103 = arith.constant dense<0.000000e+00> : vector<11x32xf32>
    %235 = tpu.matmul %232, %234, %cst_103 {dimension_numbers = #tpu.dot_dimension_numbers<[1], [0], [0], [1], [0, 0, 1, 1], [], []>} : vector<11x32xf32>, vector<32x32xf32>, vector<11x32xf32> -> vector<11x32xf32>
    %236 = arith.addf %231, %235 : vector<11x32xf32>
    %237 = vector.extract_strided_slice %225 {offsets = [2, 0], sizes = [11, 32], strides = [1, 1]} : vector<14x32xf32> to vector<11x32xf32>
    %c2_104 = arith.constant 2 : index
    %c0_105 = arith.constant 0 : index
    %c0_106 = arith.constant 0 : index
    %238 = vector.load %arg14[%c2_104, %c0_105, %c0_106] : memref<4x32x32xf32, #tpu.memory_space<vmem>>, vector<1x32x32xf32>
    %239 = vector.shape_cast %238 : vector<1x32x32xf32> to vector<32x32xf32>
    %cst_107 = arith.constant dense<0.000000e+00> : vector<11x32xf32>
    %240 = tpu.matmul %237, %239, %cst_107 {dimension_numbers = #tpu.dot_dimension_numbers<[1], [0], [0], [1], [0, 0, 1, 1], [], []>} : vector<11x32xf32>, vector<32x32xf32>, vector<11x32xf32> -> vector<11x32xf32>
    %241 = arith.addf %236, %240 : vector<11x32xf32>
    %242 = vector.extract_strided_slice %225 {offsets = [3, 0], sizes = [11, 32], strides = [1, 1]} : vector<14x32xf32> to vector<11x32xf32>
    %c3 = arith.constant 3 : index
    %c0_108 = arith.constant 0 : index
    %c0_109 = arith.constant 0 : index
    %243 = vector.load %arg14[%c3, %c0_108, %c0_109] : memref<4x32x32xf32, #tpu.memory_space<vmem>>, vector<1x32x32xf32>
    %244 = vector.shape_cast %243 : vector<1x32x32xf32> to vector<32x32xf32>
    %cst_110 = arith.constant dense<0.000000e+00> : vector<11x32xf32>
    %245 = tpu.matmul %242, %244, %cst_110 {dimension_numbers = #tpu.dot_dimension_numbers<[1], [0], [0], [1], [0, 0, 1, 1], [], []>} : vector<11x32xf32>, vector<32x32xf32>, vector<11x32xf32> -> vector<11x32xf32>
    %246 = arith.addf %241, %245 : vector<11x32xf32>
    %247 = tpu.iota {dimensions = array<i32: 0>} : vector<11x1xi32>
    %c10_i32_111 = arith.constant 10 : i32
    %c0_i32_112 = arith.constant 0 : i32
    %248 = arith.cmpi eq, %c10_i32_111, %c0_i32_112 : i32
    %c1_i32_113 = arith.constant 1 : i32
    %249 = arith.select %248, %c1_i32_113, %c10_i32_111 : i32
    %250 = vector.broadcast %249 : i32 to vector<11x1xi32>
    %251 = arith.remsi %247, %250 : vector<11x1xi32>
    %c0_i32_114 = arith.constant 0 : i32
    %252 = vector.broadcast %c0_i32_114 : i32 to vector<11x1xi32>
    %253 = arith.cmpi ne, %251, %252 : vector<11x1xi32>
    %c0_i32_115 = arith.constant 0 : i32
    %254 = vector.broadcast %c0_i32_115 : i32 to vector<11x1xi32>
    %255 = arith.cmpi slt, %251, %254 : vector<11x1xi32>
    %c0_i32_116 = arith.constant 0 : i32
    %256 = arith.cmpi slt, %249, %c0_i32_116 : i32
    %257 = vector.broadcast %256 : i1 to vector<11x1xi1>
    %258 = vector.broadcast %257 : vector<11x1xi1> to vector<11x1xi1>
    %259 = arith.xori %255, %258 : vector<11x1xi1>
    %260 = arith.andi %259, %253 : vector<11x1xi1>
    %261 = vector.broadcast %249 : i32 to vector<11x1xi32>
    %262 = arith.addi %251, %261 : vector<11x1xi32>
    %263 = arith.select %260, %262, %251 : vector<11x1xi1>, vector<11x1xi32>
    %c1_i32_117 = arith.constant 1 : i32
    %264 = vector.broadcast %c1_i32_117 : i32 to vector<11x1xi32>
    %265 = arith.cmpi slt, %263, %264 : vector<11x1xi32>
    %266 = arith.extui %265 : vector<11x1xi1> to vector<11x1xi32>
    %267 = arith.sitofp %266 : vector<11x1xi32> to vector<11x1xf32>
    %268 = vector.broadcast %267 : vector<11x1xf32> to vector<11x32xf32>
    %269 = arith.mulf %246, %268 : vector<11x32xf32>
    %cst_118 = arith.constant dense<0.000000e+00> : vector<32xf32>
    %270 = vector.multi_reduction <add>, %269, %cst_118 [0] : vector<11x32xf32> to vector<32xf32>
    %271 = vector.shape_cast %270 : vector<32xf32> to vector<1x32xf32>
    %cst_119 = arith.constant 2.000000e+00 : f32
    %272 = vector.broadcast %cst_119 : f32 to vector<1x32xf32>
    %273 = arith.divf %271, %272 : vector<1x32xf32>
    %274 = vector.broadcast %273 : vector<1x32xf32> to vector<11x32xf32>
    %275 = arith.subf %246, %274 : vector<11x32xf32>
    %276 = vector.broadcast %267 : vector<11x1xf32> to vector<11x32xf32>
    %277 = arith.mulf %275, %276 : vector<11x32xf32>
    %278 = arith.mulf %277, %277 : vector<11x32xf32>
    %cst_120 = arith.constant dense<0.000000e+00> : vector<32xf32>
    %279 = vector.multi_reduction <add>, %278, %cst_120 [0] : vector<11x32xf32> to vector<32xf32>
    %280 = vector.shape_cast %279 : vector<32xf32> to vector<1x32xf32>
    %cst_121 = arith.constant 2.000000e+00 : f32
    %281 = vector.broadcast %cst_121 : f32 to vector<1x32xf32>
    %282 = arith.divf %280, %281 : vector<1x32xf32>
    %c0_122 = arith.constant 0 : index
    %c0_123 = arith.constant 0 : index
    %283 = vector.load %arg15[%c0_122, %c0_123] : memref<1x32xf32, #tpu.memory_space<vmem>>, vector<1x32xf32>
    %cst_124 = arith.constant 9.99999974E-6 : f32
    %284 = vector.broadcast %cst_124 : f32 to vector<1x32xf32>
    %285 = arith.addf %282, %284 : vector<1x32xf32>
    %286 = math.rsqrt %285 : vector<1x32xf32>
    %287 = arith.mulf %283, %286 : vector<1x32xf32>
    %c0_125 = arith.constant 0 : index
    %c0_126 = arith.constant 0 : index
    %288 = vector.load %arg16[%c0_125, %c0_126] : memref<1x32xf32, #tpu.memory_space<vmem>>, vector<1x32xf32>
    %289 = arith.mulf %273, %287 : vector<1x32xf32>
    %290 = arith.subf %288, %289 : vector<1x32xf32>
    %291 = vector.broadcast %287 : vector<1x32xf32> to vector<11x32xf32>
    %292 = arith.mulf %246, %291 : vector<11x32xf32>
    %293 = vector.broadcast %290 : vector<1x32xf32> to vector<11x32xf32>
    %294 = arith.addf %292, %293 : vector<11x32xf32>
    %cst_127 = arith.constant 0.000000e+00 : f32
    %295 = vector.broadcast %cst_127 : f32 to vector<11x32xf32>
    %296 = arith.maximumf %294, %295 : vector<11x32xf32>
    %c0_128 = arith.constant 0 : index
    %c0_129 = arith.constant 0 : index
    %297 = vector.load %arg17[%c0_128, %c0_129] : memref<32x128xf32, #tpu.memory_space<vmem>>, vector<32x128xf32>
    %cst_130 = arith.constant dense<0.000000e+00> : vector<11x128xf32>
    %298 = tpu.matmul %296, %297, %cst_130 {dimension_numbers = #tpu.dot_dimension_numbers<[1], [0], [0], [1], [0, 0, 1, 1], [], []>} : vector<11x32xf32>, vector<32x128xf32>, vector<11x128xf32> -> vector<11x128xf32>
    %c0_131 = arith.constant 0 : index
    %c0_132 = arith.constant 0 : index
    %299 = vector.load %arg18[%c0_131, %c0_132] : memref<1x128xf32, #tpu.memory_space<vmem>>, vector<1x128xf32>
    %300 = vector.broadcast %299 : vector<1x128xf32> to vector<11x128xf32>
    %301 = arith.addf %298, %300 : vector<11x128xf32>
    %cst_133 = arith.constant 0.000000e+00 : f32
    %302 = vector.broadcast %cst_133 : f32 to vector<11x128xf32>
    %303 = arith.maximumf %301, %302 : vector<11x128xf32>
    %c0_134 = arith.constant 0 : index
    %c0_135 = arith.constant 0 : index
    %304 = vector.load %arg19[%c0_134, %c0_135] : memref<128x128xf32, #tpu.memory_space<vmem>>, vector<128x128xf32>
    %cst_136 = arith.constant dense<0.000000e+00> : vector<11x128xf32>
    %305 = tpu.matmul %303, %304, %cst_136 {dimension_numbers = #tpu.dot_dimension_numbers<[1], [0], [0], [1], [0, 0, 1, 1], [], []>} : vector<11x128xf32>, vector<128x128xf32>, vector<11x128xf32> -> vector<11x128xf32>
    %c0_137 = arith.constant 0 : index
    %c0_138 = arith.constant 0 : index
    %306 = vector.load %arg20[%c0_137, %c0_138] : memref<1x128xf32, #tpu.memory_space<vmem>>, vector<1x128xf32>
    %307 = vector.broadcast %306 : vector<1x128xf32> to vector<11x128xf32>
    %308 = arith.addf %305, %307 : vector<11x128xf32>
    %309 = vector.extract_strided_slice %308 {offsets = [0, 0], sizes = [1, 128], strides = [1, 1]} : vector<11x128xf32> to vector<1x128xf32>
    %c0_139 = arith.constant 0 : index
    %c0_140 = arith.constant 0 : index
    %310 = vector.load %arg21[%c0_139, %c0_140] : memref<2x128xf32, #tpu.memory_space<vmem>>, vector<1x128xf32>
    tpu.vector_store %arg21[%c0_139, %c0_140], %309 {strides = array<i32>} : memref<2x128xf32, #tpu.memory_space<vmem>>, vector<1x128xf32>,
    %311 = vector.extract_strided_slice %308 {offsets = [10, 0], sizes = [1, 128], strides = [1, 1]} : vector<11x128xf32> to vector<1x128xf32>
    %c1_141 = arith.constant 1 : index
    %c0_142 = arith.constant 0 : index
    %312 = vector.load %arg21[%c1_141, %c0_142] : memref<2x128xf32, #tpu.memory_space<vmem>>, vector<1x128xf32>
    tpu.vector_store %arg21[%c1_141, %c0_142], %311 {strides = array<i32>} : memref<2x128xf32, #tpu.memory_space<vmem>>, vector<1x128xf32>,
    return
  }
  func.func @transform_0(%arg0: i32) -> (i32, i32) {
    %c0_i32 = arith.constant 0 : i32
    %c0_i32_0 = arith.constant 0 : i32
    %c0_i32_1 = arith.constant 0 : i32
    return %c0_i32, %c0_i32_0 : i32, i32
  }
  func.func @transform_1(%arg0: i32) -> (i32, i32) {
    %c0_i32 = arith.constant 0 : i32
    %c0_i32_0 = arith.constant 0 : i32
    %c0_i32_1 = arith.constant 0 : i32
    return %c0_i32, %c0_i32_0 : i32, i32
  }
  func.func @transform_2(%arg0: i32) -> (i32, i32) {
    %c0_i32 = arith.constant 0 : i32
    %c0_i32_0 = arith.constant 0 : i32
    %c0_i32_1 = arith.constant 0 : i32
    return %c0_i32, %c0_i32_0 : i32, i32
  }
  func.func @transform_3(%arg0: i32) -> (i32, i32) {
    %c0_i32 = arith.constant 0 : i32
    %c0_i32_0 = arith.constant 0 : i32
    %c0_i32_1 = arith.constant 0 : i32
    return %c0_i32, %c0_i32_0 : i32, i32
  }
  func.func @transform_4(%arg0: i32) -> (i32, i32, i32) {
    %c0_i32 = arith.constant 0 : i32
    %c0_i32_0 = arith.constant 0 : i32
    %c0_i32_1 = arith.constant 0 : i32
    %c0_i32_2 = arith.constant 0 : i32
    return %c0_i32, %c0_i32_0, %c0_i32_1 : i32, i32, i32
  }
  func.func @transform_5(%arg0: i32) -> (i32, i32) {
    %c0_i32 = arith.constant 0 : i32
    %c0_i32_0 = arith.constant 0 : i32
    %c0_i32_1 = arith.constant 0 : i32
    return %c0_i32, %c0_i32_0 : i32, i32
  }
  func.func @transform_6(%arg0: i32) -> (i32, i32) {
    %c0_i32 = arith.constant 0 : i32
    %c0_i32_0 = arith.constant 0 : i32
    %c0_i32_1 = arith.constant 0 : i32
    return %c0_i32, %c0_i32_0 : i32, i32
  }
  func.func @transform_7(%arg0: i32) -> (i32, i32, i32) {
    %c0_i32 = arith.constant 0 : i32
    %c0_i32_0 = arith.constant 0 : i32
    %c0_i32_1 = arith.constant 0 : i32
    %c0_i32_2 = arith.constant 0 : i32
    return %c0_i32, %c0_i32_0, %c0_i32_1 : i32, i32, i32
  }
  func.func @transform_8(%arg0: i32) -> (i32, i32) {
    %c0_i32 = arith.constant 0 : i32
    %c0_i32_0 = arith.constant 0 : i32
    %c0_i32_1 = arith.constant 0 : i32
    return %c0_i32, %c0_i32_0 : i32, i32
  }
  func.func @transform_9(%arg0: i32) -> (i32, i32) {
    %c0_i32 = arith.constant 0 : i32
    %c0_i32_0 = arith.constant 0 : i32
    %c0_i32_1 = arith.constant 0 : i32
    return %c0_i32, %c0_i32_0 : i32, i32
  }
  func.func @transform_10(%arg0: i32) -> (i32, i32, i32) {
    %c0_i32 = arith.constant 0 : i32
    %c0_i32_0 = arith.constant 0 : i32
    %c0_i32_1 = arith.constant 0 : i32
    %c0_i32_2 = arith.constant 0 : i32
    return %c0_i32, %c0_i32_0, %c0_i32_1 : i32, i32, i32
  }
  func.func @transform_11(%arg0: i32) -> (i32, i32) {
    %c0_i32 = arith.constant 0 : i32
    %c0_i32_0 = arith.constant 0 : i32
    %c0_i32_1 = arith.constant 0 : i32
    return %c0_i32, %c0_i32_0 : i32, i32
  }
  func.func @transform_12(%arg0: i32) -> (i32, i32) {
    %c0_i32 = arith.constant 0 : i32
    %c0_i32_0 = arith.constant 0 : i32
    %c0_i32_1 = arith.constant 0 : i32
    return %c0_i32, %c0_i32_0 : i32, i32
  }
  func.func @transform_13(%arg0: i32) -> (i32, i32, i32) {
    %c0_i32 = arith.constant 0 : i32
    %c0_i32_0 = arith.constant 0 : i32
    %c0_i32_1 = arith.constant 0 : i32
    %c0_i32_2 = arith.constant 0 : i32
    return %c0_i32, %c0_i32_0, %c0_i32_1 : i32, i32, i32
  }
  func.func @transform_14(%arg0: i32) -> (i32, i32) {
    %c0_i32 = arith.constant 0 : i32
    %c0_i32_0 = arith.constant 0 : i32
    %c0_i32_1 = arith.constant 0 : i32
    return %c0_i32, %c0_i32_0 : i32, i32
  }
  func.func @transform_15(%arg0: i32) -> (i32, i32) {
    %c0_i32 = arith.constant 0 : i32
    %c0_i32_0 = arith.constant 0 : i32
    %c0_i32_1 = arith.constant 0 : i32
    return %c0_i32, %c0_i32_0 : i32, i32
  }
  func.func @transform_16(%arg0: i32) -> (i32, i32) {
    %c0_i32 = arith.constant 0 : i32
    %c0_i32_0 = arith.constant 0 : i32
    %c0_i32_1 = arith.constant 0 : i32
    return %c0_i32, %c0_i32_0 : i32, i32
  }
  func.func @transform_17(%arg0: i32) -> (i32, i32) {
    %c0_i32 = arith.constant 0 : i32
    %c0_i32_0 = arith.constant 0 : i32
    %c0_i32_1 = arith.constant 0 : i32
    return %c0_i32, %c0_i32_0 : i32, i32
  }
  func.func @transform_18(%arg0: i32) -> (i32, i32) {
    %c0_i32 = arith.constant 0 : i32
    %c0_i32_0 = arith.constant 0 : i32
    %c0_i32_1 = arith.constant 0 : i32
    return %c0_i32, %c0_i32_0 : i32, i32
  }
  func.func @transform_19(%arg0: i32) -> (i32, i32) {
    %c0_i32 = arith.constant 0 : i32
    %c0_i32_0 = arith.constant 0 : i32
    %c0_i32_1 = arith.constant 0 : i32
    return %c0_i32, %c0_i32_0 : i32, i32
  }
  func.func @transform_20(%arg0: i32) -> (i32, i32) {
    %c0_i32 = arith.constant 0 : i32
    %c0_i32_0 = arith.constant 0 : i32
    %c0_i32_1 = arith.constant 0 : i32
    return %c0_i32, %c0_i32_0 : i32, i32
  }
}

</mosaic_0001>

<bundles_post_ra>
// kernel: cnn_forward.1
= control target key start
LH: loop header
LB: loop body
LE: loop exit
PB: predicated region body
PF: predicated region fallthrough
CT: control target
= control target key end

     0   :  { %s4307_s0 = inlined_call_operand.vmem [shape: f32[20,1250], index: 0, kind: input, shape index: {}]   ;;  %s4308_s1 = inlined_call_operand.vmem [shape: f32[1250,8], index: 1, kind: input, shape index: {}]   ;;  %s4309_s2 = inlined_call_operand.vmem [shape: f32[1,8], index: 2, kind: input, shape index: {}]   ;;  %s4310_s3 = inlined_call_operand.vmem [shape: f32[1,8], index: 3, kind: input, shape index: {}]   ;;  %s4311_s4 = inlined_call_operand.vmem [shape: f32[3,8,16], index: 4, kind: input, shape index: {}]   ;;  %s4312_s5 = inlined_call_operand.vmem [shape: f32[1,16], index: 5, kind: input, shape index: {}]   ;;  %s4313_s6 = inlined_call_operand.vmem [shape: f32[1,16], index: 6, kind: input, shape index: {}]   ;;  %s4314_s7 = inlined_call_operand.vmem [shape: f32[3,16,32], index: 7, kind: input, shape index: {}]   ;;  %s4315_s8 = inlined_call_operand.vmem [shape: f32[1,32], index: 8, kind: input, shape index: {}]   ;;  %s4316_s9 = inlined_call_operand.vmem [shape: f32[1,32], index: 9, kind: input, shape index: {}]   ;;  %s4317_s10 = inlined_call_operand.vmem [shape: f32[3,32,32], index: 10, kind: input, shape index: {}]   ;;  %s4318_s11 = inlined_call_operand.vmem [shape: f32[1,32], index: 11, kind: input, shape index: {}]   ;;  %s4319_s12 = inlined_call_operand.vmem [shape: f32[1,32], index: 12, kind: input, shape index: {}]   ;;  %s4320_s13 = inlined_call_operand.vmem [shape: f32[4,32,32], index: 13, kind: input, shape index: {}]   ;;  %s4321_s14 = inlined_call_operand.vmem [shape: f32[1,32], index: 14, kind: input, shape index: {}]   ;;  %s4322_s15 = inlined_call_operand.vmem [shape: f32[1,32], index: 15, kind: input, shape index: {}]   ;;  %s4323_s16 = inlined_call_operand.vmem [shape: f32[32,128], index: 16, kind: input, shape index: {}]   ;;  %s4324_s17 = inlined_call_operand.vmem [shape: f32[1,128], index: 17, kind: input, shape index: {}]   ;;  %s4325_s18 = inlined_call_operand.vmem [shape: f32[128,128], index: 18, kind: input, shape index: {}]   ;;  %s4326_s19 = inlined_call_operand.vmem [shape: f32[1,128], index: 19, kind: input, shape index: {}]   ;;  %s4327_s20 = inlined_call_operand.hbm [shape: f32[2,128], index: 20, kind: output, shape index: {}]  }
   0x1   :  { %4331 = sst [smem:[#allocation5_spill]] %s4307_s0 }
   0x2   :  { %4332 = sst [smem:[#allocation6_spill]] %s4308_s1 }
   0x3   :  { %4333 = sst [smem:[#allocation7_spill]] %s4309_s2 }
   0x4   :  { %4334 = sst [smem:[#allocation8_spill]] %s4310_s3 }
   0x5   :  { %4335 = sst [smem:[#allocation9_spill]] %s4311_s4 }
   0x6   :  { %s4336_s23 = sld [smem:[#allocation6_spill]]  ;;  %s4337_s1 = sld [smem:[#allocation5_spill]] }
   0xc   :  { %v112_v0 = vld [vmem:[%s4336_s23 + $0x80] sm:$0xff]  ;;  %v113_v1 = vld [vmem:[%s4336_s23 + $0x88] sm:$0xff]  ;;  %v114_v11 = vld [vmem:[%s4336_s23 + $0x90] sm:$0xff] }
   0xd   :  { %v144_v2 = vld [vmem:[%s4336_s23 + $0x180] sm:$0xff]  ;;  %v2903_v3 = vpack.c.bf16 %v113_v1, %v112_v0  ;;  %v145_v4 = vld [vmem:[%s4336_s23 + $0x188] sm:$0xff]  ;;  %v115_v13 = vld [vmem:[%s4336_s23 + $0x98] sm:$0xff] }
   0xe   :  { %v96_v5 = vld [vmem:[%s4336_s23] sm:$0xff]  ;;  %v97_v6 = vld [vmem:[%s4336_s23 + $0x8] sm:$0xff]  ;;  %v2935_v7 = vpack.c.bf16 %v145_v4, %v144_v2  ;;  %v146_v14 = vld [vmem:[%s4336_s23 + $0x190] sm:$0xff]  ;;  %v2907_v16 = vpack.c.bf16 %v115_v13, %v114_v11 }
   0xf   :  { %v2905_v8 = vpack.c.bf16 %v97_v6, %v96_v5  ;;  %v128_v9 = vld [vmem:[%s4336_s23 + $0x100] sm:$0xff]  ;;  %v129_v10 = vld [vmem:[%s4336_s23 + $0x108] sm:$0xff]  ;;  %2904 = vmatprep.subr.bf16.mxu0 %v2903_v3  ;;  %v147_v15 = vld [vmem:[%s4336_s23 + $0x198] sm:$0xff] }
  0x10   :  { %v2937_v12 = vpack.c.bf16 %v129_v10, %v128_v9  ;;  %2936 = vmatprep.subr.bf16.mxu1 %v2935_v7  ;;  %v2939_v17 = vpack.c.bf16 %v147_v15, %v146_v14  ;;  %v98_v18 = vld [vmem:[%s4336_s23 + $0x10] sm:$0xff]  ;;  %v99_v19 = vld [vmem:[%s4336_s23 + $0x18] sm:$0xff]  ;;  %v116_v23 = vld [vmem:[%s4336_s23 + $0xa0] sm:$0xff] }
  0x11   :  { %2906 = vmatpush3.bf16.msra.mxu0 %v2905_v8  ;;  %v130_v20 = vld [vmem:[%s4336_s23 + $0x110] sm:$0xff]  ;;  %v2909_v21 = vpack.c.bf16 %v99_v19, %v98_v18  ;;  %v131_v22 = vld [vmem:[%s4336_s23 + $0x118] sm:$0xff]  ;;  %v117_v24 = vld [vmem:[%s4336_s23 + $0xa8] sm:$0xff] }
  0x12   :  { %2938 = vmatpush3.bf16.msra.mxu1 %v2937_v12  ;;  %2908 = vmatprep.subr.bf16.mxu0 %v2907_v16  ;;  %v2941_v25 = vpack.c.bf16 %v131_v22, %v130_v20  ;;  %v2911_v26 = vpack.c.bf16 %v117_v24, %v116_v23  ;;  %v148_v27 = vld [vmem:[%s4336_s23 + $0x1a0] sm:$0xff]  ;;  %v149_v28 = vld [vmem:[%s4336_s23 + $0x1a8] sm:$0xff]  ;;  %v118_v35 = vld [vmem:[%s4336_s23 + $0xb0] sm:$0xff] }
  0x13   :  { %2940 = vmatprep.subr.bf16.mxu1 %v2939_v17  ;;  %v100_v29 = vld [vmem:[%s4336_s23 + $0x20] sm:$0xff]  ;;  %v2943_v30 = vpack.c.bf16 %v149_v28, %v148_v27  ;;  %v101_v31 = vld [vmem:[%s4336_s23 + $0x28] sm:$0xff]  ;;  %v119_v36 = vld [vmem:[%s4336_s23 + $0xb8] sm:$0xff] }
  0x14   :  { %v132_v32 = vld [vmem:[%s4336_s23 + $0x120] sm:$0xff]  ;;  %v133_v33 = vld [vmem:[%s4336_s23 + $0x128] sm:$0xff]  ;;  %v2913_v34 = vpack.c.bf16 %v101_v31, %v100_v29  ;;  %v150_v37 = vld [vmem:[%s4336_s23 + $0x1b0] sm:$0xff]  ;;  %v2915_v39 = vpack.c.bf16 %v119_v36, %v118_v35 }
  0x15   :  { %2910 = vmatpush3.bf16.msra.mxu0 %v2909_v21  ;;  %v2945_v38 = vpack.c.bf16 %v133_v33, %v132_v32  ;;  %v151_v40 = vld [vmem:[%s4336_s23 + $0x1b8] sm:$0xff]  ;;  %v102_v41 = vld [vmem:[%s4336_s23 + $0x30] sm:$0xff]  ;;  %v120_v46 = vld [vmem:[%s4336_s23 + $0xc0] sm:$0xff] }
  0x16   :  { %2942 = vmatpush3.bf16.msra.mxu1 %v2941_v25  ;;  %2912 = vmatprep.subr.bf16.mxu0 %v2911_v26  ;;  %v103_v42 = vld [vmem:[%s4336_s23 + $0x38] sm:$0xff]  ;;  %v2947_v43 = vpack.c.bf16 %v151_v40, %v150_v37  ;;  %v134_v44 = vld [vmem:[%s4336_s23 + $0x130] sm:$0xff]  ;;  %v121_v47 = vld [vmem:[%s4336_s23 + $0xc8] sm:$0xff] }
  0x17   :  { %2944 = vmatprep.subr.bf16.mxu1 %v2943_v30  ;;  %v135_v45 = vld [vmem:[%s4336_s23 + $0x138] sm:$0xff]  ;;  %v152_v48 = vld [vmem:[%s4336_s23 + $0x1c0] sm:$0xff]  ;;  %v153_v49 = vld [vmem:[%s4336_s23 + $0x1c8] sm:$0xff]  ;;  %v2917_v50 = vpack.c.bf16 %v103_v42, %v102_v41  ;;  %v2919_v52 = vpack.c.bf16 %v121_v47, %v120_v46 }
  0x18   :  { %v2949_v51 = vpack.c.bf16 %v135_v45, %v134_v44  ;;  %v104_v53 = vld [vmem:[%s4336_s23 + $0x40] sm:$0xff]  ;;  %v105_v54 = vld [vmem:[%s4336_s23 + $0x48] sm:$0xff]  ;;  %v2951_v56 = vpack.c.bf16 %v153_v49, %v152_v48  ;;  %v122_v58 = vld [vmem:[%s4336_s23 + $0xd0] sm:$0xff] }
  0x19   :  { %2914 = vmatpush3.bf16.msra.mxu0 %v2913_v34  ;;  %v136_v55 = vld [vmem:[%s4336_s23 + $0x140] sm:$0xff]  ;;  %v137_v57 = vld [vmem:[%s4336_s23 + $0x148] sm:$0xff]  ;;  %v123_v59 = vld [vmem:[%s4336_s23 + $0xd8] sm:$0xff]  ;;  %v2921_v62 = vpack.c.bf16 %v105_v54, %v104_v53 }
  0x1a   :  { %2946 = vmatpush3.bf16.msra.mxu1 %v2945_v38  ;;  %2916 = vmatprep.subr.bf16.mxu0 %v2915_v39  ;;  %v154_v60 = vld [vmem:[%s4336_s23 + $0x1d0] sm:$0xff]  ;;  %v155_v61 = vld [vmem:[%s4336_s23 + $0x1d8] sm:$0xff]  ;;  %v2953_v63 = vpack.c.bf16 %v137_v57, %v136_v55  ;;  %v2923_v0 = vpack.c.bf16 %v123_v59, %v122_v58  ;;  %v124_v6 = vld [vmem:[%s4336_s23 + $0xe0] sm:$0xff] }
  0x1b   :  { %2948 = vmatprep.subr.bf16.mxu1 %v2947_v43  ;;  %v106_v1 = vld [vmem:[%s4336_s23 + $0x50] sm:$0xff]  ;;  %v107_v2 = vld [vmem:[%s4336_s23 + $0x58] sm:$0xff]  ;;  %v2955_v4 = vpack.c.bf16 %v155_v61, %v154_v60  ;;  %v125_v7 = vld [vmem:[%s4336_s23 + $0xe8] sm:$0xff] }
  0x1c   :  { %v138_v3 = vld [vmem:[%s4336_s23 + $0x150] sm:$0xff]  ;;  %v139_v5 = vld [vmem:[%s4336_s23 + $0x158] sm:$0xff]  ;;  %v156_v8 = vld [vmem:[%s4336_s23 + $0x1e0] sm:$0xff]  ;;  %v2925_v10 = vpack.c.bf16 %v107_v2, %v106_v1  ;;  %v2927_v14 = vpack.c.bf16 %v125_v7, %v124_v6 }
  0x1d   :  { %2918 = vmatpush3.bf16.msra.mxu0 %v2917_v50  ;;  %v157_v9 = vld [vmem:[%s4336_s23 + $0x1e8] sm:$0xff]  ;;  %v108_v11 = vld [vmem:[%s4336_s23 + $0x60] sm:$0xff]  ;;  %v2957_v13 = vpack.c.bf16 %v139_v5, %v138_v3  ;;  %v69_v17 = vld [vmem:[%s4337_s1 + $0x18] sm:$0xff] }
  0x1e   :  { %2950 = vmatpush3.bf16.msra.mxu1 %v2949_v51  ;;  %2920 = vmatprep.subr.bf16.mxu0 %v2919_v52  ;;  %v109_v12 = vld [vmem:[%s4336_s23 + $0x68] sm:$0xff]  ;;  %v140_v15 = vld [vmem:[%s4336_s23 + $0x160] sm:$0xff]  ;;  %v2959_v18 = vpack.c.bf16 %v157_v9, %v156_v8  ;;  %v126_v20 = vld [vmem:[%s4336_s23 + $0xf0] sm:$0xff] }
  0x1f   :  { %2952 = vmatprep.subr.bf16.mxu1 %v2951_v56  ;;  %v67_v16 = vld [vmem:[%s4337_s1 + $0x8] sm:$0xff]  ;;  %v127_v21 = vld [vmem:[%s4336_s23 + $0xf8] sm:$0xff]  ;;  %v158_v22 = vld [vmem:[%s4336_s23 + $0x1f0] sm:$0xff]  ;;  %411 = vmatprep.mubr.f32.mxu1 %v69_v17  ;;  %v2929_v24 = vpack.c.bf16 %v109_v12, %v108_v11 }
  0x20   :  { %v141_v19 = vld [vmem:[%s4336_s23 + $0x168] sm:$0xff]  ;;  %331 = vmatprep.mubr.f32.mxu0 %v67_v16  ;;  %v159_v23 = vld [vmem:[%s4336_s23 + $0x1f8] sm:$0xff]  ;;  %v2931_v26 = vpack.c.bf16 %v127_v21, %v126_v20  ;;  %v110_v27 = vld [vmem:[%s4336_s23 + $0x70] sm:$0xff] }
  0x21   :  { %2922 = vmatpush3.bf16.msra.mxu0 %v2921_v62  ;;  %v2961_v25 = vpack.c.bf16 %v141_v19, %v140_v15  ;;  %v111_v28 = vld [vmem:[%s4336_s23 + $0x78] sm:$0xff]  ;;  %v142_v29 = vld [vmem:[%s4336_s23 + $0x170] sm:$0xff]  ;;  %v2963_v30 = vpack.c.bf16 %v159_v23, %v158_v22  ;;  %v176_v32 = vld [vmem:[%s4336_s23 + $0x280] sm:$0xff] }
  0x22   :  { %2954 = vmatpush3.bf16.msra.mxu1 %v2953_v63  ;;  %2924 = vmatprep.subr.bf16.mxu0 %v2923_v0  ;;  %v143_v31 = vld [vmem:[%s4336_s23 + $0x178] sm:$0xff]  ;;  %v177_v33 = vld [vmem:[%s4336_s23 + $0x288] sm:$0xff]  ;;  %v208_v34 = vld [vmem:[%s4336_s23 + $0x380] sm:$0xff]  ;;  %v2933_v36 = vpack.c.bf16 %v111_v28, %v110_v27 }
  0x23   :  { %2956 = vmatprep.subr.bf16.mxu1 %v2955_v4  ;;  %v209_v35 = vld [vmem:[%s4336_s23 + $0x388] sm:$0xff]  ;;  %v2965_v37 = vpack.c.bf16 %v143_v31, %v142_v29  ;;  %v2967_v38 = vpack.c.bf16 %v177_v33, %v176_v32  ;;  %v160_v39 = vld [vmem:[%s4336_s23 + $0x200] sm:$0xff]  ;;  %v178_v44 = vld [vmem:[%s4336_s23 + $0x290] sm:$0xff] }
  0x24   :  { %v161_v40 = vld [vmem:[%s4336_s23 + $0x208] sm:$0xff]  ;;  %v192_v41 = vld [vmem:[%s4336_s23 + $0x300] sm:$0xff]  ;;  %v2999_v42 = vpack.c.bf16 %v209_v35, %v208_v34  ;;  %v179_v45 = vld [vmem:[%s4336_s23 + $0x298] sm:$0xff] }
  0x25   :  { %2926 = vmatpush3.bf16.msra.mxu0 %v2925_v10  ;;  %v193_v43 = vld [vmem:[%s4336_s23 + $0x308] sm:$0xff]  ;;  %v210_v46 = vld [vmem:[%s4336_s23 + $0x390] sm:$0xff]  ;;  %v211_v47 = vld [vmem:[%s4336_s23 + $0x398] sm:$0xff]  ;;  %v2969_v50 = vpack.c.bf16 %v161_v40, %v160_v39  ;;  %v2971_v52 = vpack.c.bf16 %v179_v45, %v178_v44 }
  0x26   :  { %2958 = vmatpush3.bf16.msra.mxu1 %v2957_v13  ;;  %2928 = vmatprep.subr.bf16.mxu0 %v2927_v14  ;;  %v66_v48 = vld [vmem:[%s4337_s1] sm:$0xff]  ;;  %v68_v49 = vld [vmem:[%s4337_s1 + $0x10] sm:$0xff]  ;;  %v3001_v51 = vpack.c.bf16 %v193_v43, %v192_v41  ;;  %v163_v54 = vld [vmem:[%s4336_s23 + $0x218] sm:$0xff]  ;;  %v3003_v56 = vpack.c.bf16 %v211_v47, %v210_v46 }
  0x27   :  { %2960 = vmatprep.subr.bf16.mxu1 %v2959_v18  ;;  %v162_v53 = vld [vmem:[%s4336_s23 + $0x210] sm:$0xff]  ;;  %v195_v57 = vld [vmem:[%s4336_s23 + $0x318] sm:$0xff]  ;;  %v180_v58 = vld [vmem:[%s4336_s23 + $0x2a0] sm:$0xff] }
  0x28   :  { %v194_v55 = vld [vmem:[%s4336_s23 + $0x310] sm:$0xff]  ;;  %v181_v59 = vld [vmem:[%s4336_s23 + $0x2a8] sm:$0xff]  ;;  %v212_v60 = vld [vmem:[%s4336_s23 + $0x3a0] sm:$0xff]  ;;  %v2973_v62 = vpack.c.bf16 %v163_v54, %v162_v53 }
  0x29   :  { %2930 = vmatpush3.bf16.msra.mxu0 %v2929_v24  ;;  %v213_v61 = vld [vmem:[%s4336_s23 + $0x3a8] sm:$0xff]  ;;  %v164_v63 = vld [vmem:[%s4336_s23 + $0x220] sm:$0xff]  ;;  %v3005_v2 = vpack.c.bf16 %v195_v57, %v194_v55  ;;  %v2975_v3 = vpack.c.bf16 %v181_v59, %v180_v58  ;;  %v182_v5 = vld [vmem:[%s4336_s23 + $0x2b0] sm:$0xff] }
  0x2a   :  { %2962 = vmatpush3.bf16.msra.mxu1 %v2961_v25  ;;  %2932 = vmatprep.subr.bf16.mxu0 %v2931_v26  ;;  %v165_v0 = vld [vmem:[%s4336_s23 + $0x228] sm:$0xff]  ;;  %v196_v1 = vld [vmem:[%s4336_s23 + $0x320] sm:$0xff]  ;;  %v183_v6 = vld [vmem:[%s4336_s23 + $0x2b8] sm:$0xff]  ;;  %v3007_v7 = vpack.c.bf16 %v213_v61, %v212_v60 }
  0x2b   :  { %2964 = vmatprep.subr.bf16.mxu1 %v2963_v30  ;;  %v197_v4 = vld [vmem:[%s4336_s23 + $0x328] sm:$0xff]  ;;  %v214_v8 = vld [vmem:[%s4336_s23 + $0x3b0] sm:$0xff]  ;;  %v77_v9 = vld [vmem:[%s4337_s1 + $0x58] sm:$0xff]  ;;  %v2977_v14 = vpack.c.bf16 %v165_v0, %v164_v63  ;;  %v2979_v19 = vpack.c.bf16 %v183_v6, %v182_v5 }
  0x2c   :  { %v79_v10 = vld [vmem:[%s4337_s1 + $0x68] sm:$0xff]  ;;  %v215_v11 = vld [vmem:[%s4336_s23 + $0x3b8] sm:$0xff]  ;;  %v76_v12 = vld [vmem:[%s4337_s1 + $0x50] sm:$0xff]  ;;  %v3009_v18 = vpack.c.bf16 %v197_v4, %v196_v1 }
  0x2d   :  { %2934 = vmatpush3.bf16.msra.mxu0 %v2933_v36  ;;  %v78_v13 = vld [vmem:[%s4337_s1 + $0x60] sm:$0xff]  ;;  %v166_v15 = vld [vmem:[%s4336_s23 + $0x230] sm:$0xff]  ;;  %v167_v16 = vld [vmem:[%s4336_s23 + $0x238] sm:$0xff]  ;;  %v3011_v23 = vpack.c.bf16 %v215_v11, %v214_v8 }
  0x2e   :  { %2966 = vmatpush3.bf16.msra.mxu1 %v2965_v37  ;;  %2968 = vmatprep.subr.bf16.mxu0 %v2967_v38  ;;  %v198_v17 = vld [vmem:[%s4336_s23 + $0x330] sm:$0xff]  ;;  %v199_v20 = vld [vmem:[%s4336_s23 + $0x338] sm:$0xff]  ;;  %v184_v21 = vld [vmem:[%s4336_s23 + $0x2c0] sm:$0xff]  ;;  %v2981_v30 = vpack.c.bf16 %v167_v16, %v166_v15 }
  0x2f   :  { %3000 = vmatprep.subr.bf16.mxu1 %v2999_v42  ;;  %v185_v22 = vld [vmem:[%s4336_s23 + $0x2c8] sm:$0xff]  ;;  %v216_v24 = vld [vmem:[%s4336_s23 + $0x3c0] sm:$0xff]  ;;  %v89_v26 = vld [vmem:[%s4337_s1 + $0xb8] sm:$0xf]  ;;  %v3013_v32 = vpack.c.bf16 %v199_v20, %v198_v17 }
  0x30   :  { %332 = vmatmul.mubr.f32.vlgmr.msra.gmra.mrb[0].mxu0 %v66_v48  ;;  %v87_v25 = vld [vmem:[%s4337_s1 + $0xa8] sm:$0xf]  ;;  %v86_v28 = vld [vmem:[%s4337_s1 + $0xa0] sm:$0xf]  ;;  %v88_v29 = vld [vmem:[%s4337_s1 + $0xb0] sm:$0xf]  ;;  %v2983_v33 = vpack.c.bf16 %v185_v22, %v184_v21 }
  0x31   :  { %412 = vmatmul.mubr.f32.vlgmr.msra.gmra.mrb[0].mxu1 %v68_v49  ;;  %2970 = vmatpush3.bf16.msra.mxu0 %v2969_v50  ;;  %v217_v27 = vld [vmem:[%s4336_s23 + $0x3c8] sm:$0xff]  ;;  %v168_v31 = vld [vmem:[%s4336_s23 + $0x240] sm:$0xff]  ;;  %v186_v38 = vld [vmem:[%s4336_s23 + $0x2d0] sm:$0xff] }
  0x32   :  { %3002 = vmatpush3.bf16.msra.mxu1 %v3001_v51  ;;  %2972 = vmatprep.subr.bf16.mxu0 %v2971_v52  ;;  %v169_v34 = vld [vmem:[%s4336_s23 + $0x248] sm:$0xff]  ;;  %v200_v35 = vld [vmem:[%s4336_s23 + $0x340] sm:$0xff]  ;;  %v3015_v37 = vpack.c.bf16 %v217_v27, %v216_v24  ;;  %v187_v39 = vld [vmem:[%s4336_s23 + $0x2d8] sm:$0xff] }
  0x33   :  { %3004 = vmatprep.subr.bf16.mxu1 %v3003_v56  ;;  %336 = vmatprep.mubr.f32.mxu0 %v77_v9  ;;  %v201_v36 = vld [vmem:[%s4336_s23 + $0x348] sm:$0xff]  ;;  %v218_v41 = vld [vmem:[%s4336_s23 + $0x3d0] sm:$0xff]  ;;  %v219_v42 = vld [vmem:[%s4336_s23 + $0x3d8] sm:$0xff]  ;;  %v2985_v44 = vpack.c.bf16 %v169_v34, %v168_v31  ;;  %v2987_v46 = vpack.c.bf16 %v187_v39, %v186_v38 }
  0x34   :  { %416 = vmatprep.mubr.f32.mxu1 %v79_v10  ;;  %337 = vmatmul.mubr.f32.gmra.mrb[2].mxu0 %v76_v12  ;;  %v71_v40 = vld [vmem:[%s4337_s1 + $0x28] sm:$0xff]  ;;  %v73_v43 = vld [vmem:[%s4337_s1 + $0x38] sm:$0xff]  ;;  %v3017_v45 = vpack.c.bf16 %v201_v36, %v200_v35  ;;  %v170_v47 = vld [vmem:[%s4336_s23 + $0x250] sm:$0xff]  ;;  %v3019_v50 = vpack.c.bf16 %v219_v42, %v218_v41 }
  0x35   :  { %2974 = vmatpush3.bf16.msra.mxu0 %v2973_v62  ;;  %417 = vmatmul.mubr.f32.gmra.mrb[2].mxu1 %v78_v13  ;;  %v171_v48 = vld [vmem:[%s4336_s23 + $0x258] sm:$0xff]  ;;  %v202_v49 = vld [vmem:[%s4336_s23 + $0x350] sm:$0xff]  ;;  %v188_v52 = vld [vmem:[%s4336_s23 + $0x2e0] sm:$0xff] }
  0x36   :  { %3006 = vmatpush3.bf16.msra.mxu1 %v3005_v2  ;;  %2976 = vmatprep.subr.bf16.mxu0 %v2975_v3  ;;  %v203_v51 = vld [vmem:[%s4336_s23 + $0x358] sm:$0xff]  ;;  %v189_v53 = vld [vmem:[%s4336_s23 + $0x2e8] sm:$0xff]  ;;  %v220_v54 = vld [vmem:[%s4336_s23 + $0x3e0] sm:$0xff]  ;;  %v2989_v56 = vpack.c.bf16 %v171_v48, %v170_v47 }
  0x37   :  { %3008 = vmatprep.subr.bf16.mxu1 %v3007_v7  ;;  %341 = vmatprep.mubr.f32.mxu0 %v87_v25  ;;  %v221_v55 = vld [vmem:[%s4336_s23 + $0x3e8] sm:$0xff]  ;;  %v3021_v57 = vpack.c.bf16 %v203_v51, %v202_v49  ;;  %v2991_v58 = vpack.c.bf16 %v189_v53, %v188_v52  ;;  %v172_v59 = vld [vmem:[%s4336_s23 + $0x260] sm:$0xff]  ;;  %v190_v0 = vld [vmem:[%s4336_s23 + $0x2f0] sm:$0xff] }
  0x38   :  { %421 = vmatprep.mubr.f32.mxu1 %v89_v26  ;;  %342 = vmatmul.mubr.f32.gmra.mrb[4].mxu0 %v86_v28  ;;  %v173_v60 = vld [vmem:[%s4336_s23 + $0x268] sm:$0xff]  ;;  %v204_v61 = vld [vmem:[%s4336_s23 + $0x360] sm:$0xff]  ;;  %v3023_v62 = vpack.c.bf16 %v221_v55, %v220_v54  ;;  %v191_v1 = vld [vmem:[%s4336_s23 + $0x2f8] sm:$0xff] }
  0x39   :  { %2978 = vmatpush3.bf16.msra.mxu0 %v2977_v14  ;;  %422 = vmatmul.mubr.f32.gmra.mrb[4].mxu1 %v88_v29  ;;  %v205_v63 = vld [vmem:[%s4336_s23 + $0x368] sm:$0xff]  ;;  %v222_v2 = vld [vmem:[%s4336_s23 + $0x3f0] sm:$0xff]  ;;  %v223_v3 = vld [vmem:[%s4336_s23 + $0x3f8] sm:$0xff]  ;;  %v2993_v4 = vpack.c.bf16 %v173_v60, %v172_v59  ;;  %v2995_v6 = vpack.c.bf16 %v191_v1, %v190_v0 }
  0x3a   :  { %3010 = vmatpush3.bf16.msra.mxu1 %v3009_v18  ;;  %2980 = vmatprep.subr.bf16.mxu0 %v2979_v19  ;;  %v3025_v5 = vpack.c.bf16 %v205_v63, %v204_v61  ;;  %v174_v7 = vld [vmem:[%s4336_s23 + $0x270] sm:$0xff]  ;;  %v175_v8 = vld [vmem:[%s4336_s23 + $0x278] sm:$0xff]  ;;  %v3027_v9 = vpack.c.bf16 %v223_v3, %v222_v2  ;;  %v224_v14 = vld [vmem:[%s4336_s23 + $0x400] sm:$0xff] }
  0x3b   :  { %3012 = vmatprep.subr.bf16.mxu1 %v3011_v23  ;;  %491 = vmatprep.mubr.f32.mxu0 %v71_v40  ;;  %v206_v10 = vld [vmem:[%s4336_s23 + $0x370] sm:$0xff]  ;;  %v207_v11 = vld [vmem:[%s4336_s23 + $0x378] sm:$0xff]  ;;  %v2997_v12 = vpack.c.bf16 %v175_v8, %v174_v7  ;;  %v225_v15 = vld [vmem:[%s4336_s23 + $0x408] sm:$0xff] }
  0x3c   :  { %571 = vmatprep.mubr.f32.mxu1 %v73_v43  ;;  %v3029_v13 = vpack.c.bf16 %v207_v11, %v206_v10 }
  0x3d   :  { %2982 = vmatpush3.bf16.msra.mxu0 %v2981_v30 }
  0x3e   :  { %3014 = vmatpush3.bf16.msra.mxu1 %v3013_v32  ;;  %2984 = vmatprep.subr.bf16.mxu0 %v2983_v33 }
  0x3f   :  { %3016 = vmatprep.subr.bf16.mxu1 %v3015_v37 }
  0x41   :  { %2986 = vmatpush3.bf16.msra.mxu0 %v2985_v44 }
  0x42   :  { %3018 = vmatpush3.bf16.msra.mxu1 %v3017_v45  ;;  %2988 = vmatprep.subr.bf16.mxu0 %v2987_v46 }
  0x43   :  { %3020 = vmatprep.subr.bf16.mxu1 %v3019_v50 }
  0x45   :  { %2990 = vmatpush3.bf16.msra.mxu0 %v2989_v56 }
  0x46   :  { %3022 = vmatpush3.bf16.msra.mxu1 %v3021_v57  ;;  %2992 = vmatprep.subr.bf16.mxu0 %v2991_v58 }
  0x47   :  { %3024 = vmatprep.subr.bf16.mxu1 %v3023_v62 }
  0x49   :  { %2994 = vmatpush3.bf16.msra.mxu0 %v2993_v4 }
  0x4a   :  { %3026 = vmatpush3.bf16.msra.mxu1 %v3025_v5  ;;  %2996 = vmatprep.subr.bf16.mxu0 %v2995_v6 }
  0x4b   :  { %3028 = vmatprep.subr.bf16.mxu1 %v3027_v9 }
  0x4c   :  { %25 = vsyncpa [#allocation3], 0  ;;  %v70_v16 = vld [vmem:[%s4337_s1 + $0x20] sm:$0xff]  ;;  %v3032_v17 = vpack.c.bf16 %v225_v15, %v224_v14  ;;  %v3248_v18 = vmov 0.0|0.0   ;;  %v72_v19 = vld [vmem:[%s4337_s1 + $0x30] sm:$0xff]  ;;  %v3249_v23 = vmov 0.0  }
  0x4d   :  { %2998 = vmatpush3.bf16.msra.mxu0 %v2997_v12  ;;  %v226_v20 = vld [vmem:[%s4336_s23 + $0x410] sm:$0xff]  ;;  %v227_v21 = vld [vmem:[%s4336_s23 + $0x418] sm:$0xff]  ;;  %v83_v24 = vld [vmem:[%s4337_s1 + $0x88] sm:$0xff]  ;;  %vm253_vm0 = vcmask 801792   ;;  %vm263_vm1 = vcmask 1041408   ;;  %s4338_s2 = sld [smem:[#allocation9_spill]] }
  0x4e   :  { %3030 = vmatpush3.bf16.msra.mxu1 %v3029_v13  ;;  %3031 = vmatprep.subr.bf16.mxu0 %v3248_v18  ;;  %v81_v22 = vld [vmem:[%s4337_s1 + $0x78] sm:$0xff]  ;;  %v80_v25 = vld [vmem:[%s4337_s1 + $0x70] sm:$0xff]  ;;  %v3035_v26 = vpack.c.bf16 %v227_v21, %v226_v20  ;;  %v82_v27 = vld [vmem:[%s4337_s1 + $0x80] sm:$0xff]  ;;  %vm3250_vm2 = vmmov 0   ;;  %vm667_vm3 = vcmask 64512   ;;  %vm671_vm4 = vcmask 60416  }
  0x4f   :  { %2737 = vmatprep.subr.mxu1 %v3249_v23  ;;  %v228_v28 = vld [vmem:[%s4336_s23 + $0x420] sm:$0xff]  ;;  %v229_v29 = vld [vmem:[%s4336_s23 + $0x428] sm:$0xff]  ;;  %v93_v31 = vld [vmem:[%s4337_s1 + $0xd8] sm:$0xf]  ;;  %s4339_s28 = sld [smem:[#allocation7_spill]]  ;;  %s4340_s30 = sld [smem:[#allocation8_spill]] }
  0x50   :  { %492 = vmatmul.mubr.f32.vlgmr.msra.gmra.mrb[6].mxu0 %v70_v16  ;;  %v91_v30 = vld [vmem:[%s4337_s1 + $0xc8] sm:$0xf]  ;;  %v90_v32 = vld [vmem:[%s4337_s1 + $0xc0] sm:$0xf]  ;;  %v3038_v33 = vpack.c.bf16 %v229_v29, %v228_v28  ;;  %v92_v34 = vld [vmem:[%s4337_s1 + $0xd0] sm:$0xf] }
  0x51   :  { %3033 = vmatpush1.bf16.msra.mxu0 %v3032_v17  ;;  %572 = vmatmul.mubr.f32.vlgmr.msra.gmra.mrb[6].mxu1 %v72_v19  ;;  %v230_v35 = vld [vmem:[%s4336_s23 + $0x430] sm:$0xff]  ;;  %v231_v36 = vld [vmem:[%s4336_s23 + $0x438] sm:$0xff]  ;;  %v75_v37 = vld [vmem:[%s4337_s1 + $0x48] sm:$0xff]  ;;  %vm734_vm5 = vcmask 1046528   ;;  %vm914_vm6 = vcmask 1045504  }
  0x52   :  { %496 = vmatprep.mubr.f32.mxu0 %v81_v22  ;;  %3034 = vmatprep.subr.bf16.mxu0 %v3248_v18  ;;  %v3041_v38 = vpack.c.bf16 %v231_v36, %v230_v35  ;;  %v232_v39 = vld [vmem:[%s4336_s23 + $0x440] sm:$0xff]  ;;  %v233_v40 = vld [vmem:[%s4336_s23 + $0x448] sm:$0xff]  ;;  %v234_v42 = vld [vmem:[%s4336_s23 + $0x450] sm:$0xff] }
  0x53   :  { %576 = vmatprep.mubr.f32.mxu1 %v83_v24  ;;  %v3044_v41 = vpack.c.bf16 %v233_v40, %v232_v39  ;;  %v235_v43 = vld [vmem:[%s4336_s23 + $0x458] sm:$0xff]  ;;  %v236_v45 = vld [vmem:[%s4336_s23 + $0x460] sm:$0xff]  ;;  %v237_v46 = vld [vmem:[%s4336_s23 + $0x468] sm:$0xff] }
  0x54   :  { %497 = vmatmul.mubr.f32.gmra.mrb[8].mxu0 %v80_v25  ;;  %v3047_v44 = vpack.c.bf16 %v235_v43, %v234_v42  ;;  %v3050_v47 = vpack.c.bf16 %v237_v46, %v236_v45  ;;  %v238_v48 = vld [vmem:[%s4336_s23 + $0x470] sm:$0xff]  ;;  %v239_v49 = vld [vmem:[%s4336_s23 + $0x478] sm:$0xff]  ;;  %v240_v51 = vld [vmem:[%s4336_s23 + $0x480] sm:$0xff] }
  0x55   :  { %3036 = vmatpush1.bf16.msra.mxu0 %v3035_v26  ;;  %577 = vmatmul.mubr.f32.gmra.mrb[8].mxu1 %v82_v27  ;;  %v3053_v50 = vpack.c.bf16 %v239_v49, %v238_v48  ;;  %v241_v52 = vld [vmem:[%s4336_s23 + $0x488] sm:$0xff]  ;;  %v242_v54 = vld [vmem:[%s4336_s23 + $0x490] sm:$0xff]  ;;  %v243_v55 = vld [vmem:[%s4336_s23 + $0x498] sm:$0xff] }
  0x56   :  { %501 = vmatprep.mubr.f32.mxu0 %v91_v30  ;;  %3037 = vmatprep.subr.bf16.mxu0 %v3248_v18  ;;  %v3056_v53 = vpack.c.bf16 %v241_v52, %v240_v51  ;;  %v3059_v56 = vpack.c.bf16 %v243_v55, %v242_v54  ;;  %v244_v57 = vld [vmem:[%s4336_s23 + $0x4a0] sm:$0xff]  ;;  %v245_v58 = vld [vmem:[%s4336_s23 + $0x4a8] sm:$0xff]  ;;  %v246_v60 = vld [vmem:[%s4336_s23 + $0x4b0] sm:$0xff] }
  0x57   :  { %581 = vmatprep.mubr.f32.mxu1 %v93_v31  ;;  %v3062_v59 = vpack.c.bf16 %v245_v58, %v244_v57  ;;  %v247_v61 = vld [vmem:[%s4336_s23 + $0x4b8] sm:$0xff]  ;;  %v248_v63 = vld [vmem:[%s4336_s23 + $0x4c0] sm:$0xff]  ;;  %v249_v0 = vld [vmem:[%s4336_s23 + $0x4c8] sm:$0xff] }
  0x58   :  { %502 = vmatmul.mubr.f32.gmra.mrb[10].mxu0 %v90_v32  ;;  %v3065_v62 = vpack.c.bf16 %v247_v61, %v246_v60  ;;  %v3068_v1 = vpack.c.bf16 %v249_v0, %v248_v63  ;;  %v250_v2 = vld [vmem:[%s4336_s23 + $0x4d0] sm:$0xff]  ;;  %v251_v3 = vld [vmem:[%s4336_s23 + $0x4d8] sm:$0xff]  ;;  %v252_v5 = vld [vmem:[%s4336_s23 + $0x4e0] sm:$0x3] }
  0x59   :  { %3039 = vmatpush1.bf16.msra.mxu0 %v3038_v33  ;;  %582 = vmatmul.mubr.f32.gmra.mrb[10].mxu1 %v92_v34  ;;  %v3071_v4 = vpack.c.bf16 %v251_v3, %v250_v2  ;;  %v74_v6 = vld [vmem:[%s4337_s1 + $0x40] sm:$0xff]  ;;  %v85_v7 = vld [vmem:[%s4337_s1 + $0x98] sm:$0xff]  ;;  %v84_v8 = vld [vmem:[%s4337_s1 + $0x90] sm:$0xff] }
  0x5a   :  { %3040 = vmatprep.subr.bf16.mxu0 %v3248_v18  ;;  %2401 = vmatprep.mubr.msk.f32.mxu0 %vm253_vm0, %v75_v37  ;;  %v95_v9 = vld [vmem:[%s4337_s1 + $0xe8] sm:$0xf]  ;;  %v94_v10 = vld [vmem:[%s4337_s1 + $0xe0] sm:$0xf] }
  0x5b   :  { %v2404_v42 = vld [vmem:[%s4338_s2 + $0x8] sm:$0xff]  ;;  %2739 = vmatprep.mubr.msk.f32.mxu1 %vm3250_vm2, %v3249_v23 }
  0x5d   :  { %3042 = vmatpush1.bf16.msra.mxu0 %v3041_v38 }
  0x5e   :  { %3043 = vmatprep.subr.bf16.mxu0 %v3248_v18 }
  0x61   :  { %3045 = vmatpush1.bf16.msra.mxu0 %v3044_v41  ;;  %v728_v41 = vld [vmem:[%s4338_s2] sm:$0xff] }
  0x62   :  { %3046 = vmatprep.subr.bf16.mxu0 %v3248_v18  ;;  %2738 = vmatpush3.msra.mxu1 %v728_v41 }
  0x63   :  { %2748 = vmatprep.subr.mxu1 %v3249_v23 }
  0x65   :  { %3048 = vmatpush1.bf16.msra.mxu0 %v3047_v44 }
  0x66   :  { %3049 = vmatprep.subr.bf16.mxu0 %v3248_v18 }
  0x69   :  { %3051 = vmatpush1.bf16.msra.mxu0 %v3050_v47 }
  0x6a   :  { %3052 = vmatprep.subr.bf16.mxu0 %v3248_v18 }
  0x6d   :  { %3054 = vmatpush1.bf16.msra.mxu0 %v3053_v50 }
  0x6e   :  { %3055 = vmatprep.subr.bf16.mxu0 %v3248_v18 }
  0x71   :  { %3057 = vmatpush1.bf16.msra.mxu0 %v3056_v53 }
  0x72   :  { %3058 = vmatprep.subr.bf16.mxu0 %v3248_v18 }
  0x75   :  { %3060 = vmatpush1.bf16.msra.mxu0 %v3059_v56 }
  0x76   :  { %3061 = vmatprep.subr.bf16.mxu0 %v3248_v18 }
  0x79   :  { %3063 = vmatpush1.bf16.msra.mxu0 %v3062_v59 }
  0x7a   :  { %3064 = vmatprep.subr.bf16.mxu0 %v3248_v18 }
  0x7d   :  { %3066 = vmatpush1.bf16.msra.mxu0 %v3065_v62 }
  0x7e   :  { %3067 = vmatprep.subr.bf16.mxu0 %v3248_v18 }
  0x81   :  { %3069 = vmatpush1.bf16.msra.mxu0 %v3068_v1 }
  0x82   :  { %3070 = vmatprep.subr.bf16.mxu0 %v3248_v18 }
  0x85   :  { %3072 = vmatpush1.bf16.msra.mxu0 %v3071_v4 }
  0x86   :  { %643 = vmatprep.subr.mxu0 %v3249_v23 }
  0x89   :  { %2400 = vmatpush1.msk.msra.mxu0 %vm263_vm1, %v252_v5 }
  0x8a   :  { %652 = vmatmul.mubr.f32.vlgmr.msra.gmra.mrb[12].mxu0 %v74_v6  ;;  %2726 = vmatprep.subr.mxu0 %v3249_v23 }
  0x8b   :  { %2402 = vmatprep.mubr.msk.f32.mxu0 %vm253_vm0, %v85_v7  ;;  %2727 = vmatpush3.msra.mxu0 %v2404_v42  ;;  %v704_v42 = vld [vmem:[%s4340_s30] sm:$0x1] }
  0x8e   :  { %657 = vmatmul.mubr.f32.gmra.mrb[14].mxu0 %v84_v8 }
  0x8f   :  { %2403 = vmatprep.mubr.msk.f32.mxu0 %vm253_vm0, %v95_v9 }
  0x92   :  { %662 = vmatmul.mubr.f32.gmra.mrb[16].mxu0 %v94_v10 }
  0x93   :  { %2728 = vmatprep.mubr.msk.f32.mxu0 %vm3250_vm2, %v3249_v23 }
 0x103   :  { %v2504_v11 = vpop.f32.mrb[0].mxu0 }
 0x104   :  { %v2545_v12 = vpop.f32.mrb[0].mxu1  ;;  %v2505_v13 = vpop.f32.mrb[1].mxu0 }
 0x105   :  { %v2506_v14 = vadd.f32 %v2505_v13, %v2504_v11  ;;  %v2546_v15 = vpop.f32.mrb[1].mxu1 }
 0x106   :  { %v2547_v16 = vadd.f32 %v2546_v15, %v2545_v12 }
 0x107   :  { %v2507_v20 = vpop.f32.mrb[2].mxu0 }
 0x108   :  { %v414_v17 = vadd.f32 %v2547_v16, %v2506_v14  ;;  %v2548_v18 = vpop.f32.mrb[2].mxu1  ;;  %v2508_v22 = vpop.f32.mrb[3].mxu0 }
 0x109   :  { %v2549_v19 = vpop.f32.mrb[3].mxu1  ;;  %v2509_v24 = vadd.f32 %v2508_v22, %v2507_v20 }
 0x10a   :  { %v2550_v21 = vadd.f32 %v2549_v19, %v2548_v18 }
 0x10b   :  { %v2510_v28 = vpop.f32.mrb[4].mxu0 }
 0x10c   :  { %v2551_v25 = vpop.f32.mrb[4].mxu1  ;;  %v419_v27 = vadd.f32 %v2550_v21, %v2509_v24  ;;  %v2511_v30 = vpop.f32.mrb[5].mxu0 }
 0x10d   :  { %v2552_v26 = vpop.f32.mrb[5].mxu1  ;;  %v2512_v31 = vadd.f32 %v2511_v30, %v2510_v28 }
 0x10e   :  { %v2553_v29 = vadd.f32 %v2552_v26, %v2551_v25 }
 0x110   :  { %v424_v32 = vadd.f32 %v2553_v29, %v2512_v31 }
 0x123   :  { %v2586_v33 = vpop.f32.mrb[6].mxu0 }
 0x124   :  { %v2587_v34 = vpop.f32.mrb[7].mxu0  ;;  %v2627_v35 = vpop.f32.mrb[6].mxu1 }
 0x125   :  { %v2588_v36 = vadd.f32 %v2587_v34, %v2586_v33  ;;  %v2628_v37 = vpop.f32.mrb[7].mxu1 }
 0x126   :  { %v2629_v38 = vadd.f32 %v2628_v37, %v2627_v35 }
 0x127   :  { %v494_v39 = vadd.f32 %v2588_v36, %v414_v17  ;;  %v2589_v40 = vpop.f32.mrb[8].mxu0  ;;  %v708_v36 = vlaneseq }
 0x128   :  { %v2590_v43 = vpop.f32.mrb[9].mxu0  ;;  %v2630_v44 = vpop.f32.mrb[8].mxu1 }
 0x129   :  { %v2591_v45 = vadd.f32 %v2590_v43, %v2589_v40  ;;  %v2631_v46 = vpop.f32.mrb[9].mxu1  ;;  %v574_v47 = vadd.f32 %v2629_v38, %v494_v39  ;;  %v3955_v37 = vshrl.u32 %v708_v36, 7  ;;  %v700_v38 = vld [vmem:[%s4339_s28] sm:$0x1] }
 0x12a   :  { %v2632_v48 = vadd.f32 %v2631_v46, %v2630_v44 }
 0x12b   :  { %v499_v49 = vadd.f32 %v2591_v45, %v419_v27  ;;  %v2592_v50 = vpop.f32.mrb[10].mxu0  ;;  %v3961_v39 = vsub.s32 0, %v3955_v37 }
 0x12c   :  { %v2593_v51 = vpop.f32.mrb[11].mxu0  ;;  %v2633_v52 = vpop.f32.mrb[10].mxu1 }
 0x12d   :  { %v2594_v53 = vadd.f32 %v2593_v51, %v2592_v50  ;;  %v2634_v54 = vpop.f32.mrb[11].mxu1  ;;  %v579_v55 = vadd.f32 %v2632_v48, %v499_v49 }
 0x12e   :  { %v2635_v56 = vadd.f32 %v2634_v54, %v2633_v52 }
 0x12f   :  { %v504_v57 = vadd.f32 %v2594_v53, %v424_v32 }
 0x131   :  { %v584_v58 = vadd.f32 %v2635_v56, %v504_v57  ;;  %v2411_v56 = vld [vmem:[%s4338_s2 + $0x10] sm:$0xff] }
 0x15d   :  { %v653_v59 = vpop.f32.mrb[12].mxu0 }
 0x15e   :  { %v654_v60 = vadd.f32 %v653_v59, %v574_v47  ;;  %v655_v61 = vpop.f32.mrb[13].mxu0 }
 0x160   :  { %v668_v1 = vsel %vm667_vm3, %v654_v60, 0.0 }
 0x161   :  { %v658_v62 = vpop.f32.mrb[14].mxu0 }
 0x162   :  { %v659_v63 = vadd.f32 %v658_v62, %v579_v55  ;;  %v660_v0 = vpop.f32.mrb[15].mxu0 }
 0x164   :  { %v669_v2 = vsel %vm667_vm3, %v659_v63, 0.0 }
 0x165   :  { %v670_v3 = vadd.f32 %v669_v2, %v668_v1  ;;  %v663_v4 = vpop.f32.mrb[16].mxu0 }
 0x166   :  { %v664_v5 = vadd.f32 %v663_v4, %v584_v58  ;;  %v665_v6 = vpop.f32.mrb[17].mxu0  ;;  %v2419_v4 = vld [vmem:[%s4314_s7 + $0x18] sm:$0xff] }
 0x167   :  { %v1137_v6 = vld [vmem:[%s4314_s7] sm:$0xff] }
 0x168   :  { %v672_v7 = vsel %vm671_vm4, %v664_v5, 0.0 }
 0x169   :  { %v673_v8 = vadd.f32 %v672_v7, %v670_v3  ;;  %v2418_v3 = vld [vmem:[%s4314_s7 + $0x10] sm:$0xff]  ;;  %v1138_v7 = vld [vmem:[%s4314_s7 + $0x8] sm:$0xff] }
 0x16b   :  { %v674_v9 = vrot.slane %v673_v8, 4 }
 0x16d   :  { %v675_v10 = vadd.f32 %v674_v9, %v673_v8  ;;  %v4010_v8 = vpack.c.bf16 %v1138_v7, %v1137_v6  ;;  %v1011_v9 = vadd.s32 8, %v3955_v37 }
 0x16f   :  { %v676_v11 = vrot.slane %v675_v10, 2 }
 0x171   :  { %v677_v12 = vadd.f32 %v676_v11, %v675_v10  ;;  %v4015_v10 = vmul.u32.u64.low 3435973837, %v3955_v37  ;;  %v4016_v11 = vmul.u32.u64.high 3435973837, %v3955_v37, %v4015_v10 }
 0x173   :  { %v678_v13 = vrot.slane %v677_v12, 1 }
 0x175   :  { %v679_v14 = vadd.f32 %v678_v13, %v677_v12  ;;  %v4018_v12 = vmul.u32.u64.low 3435973837, %v1011_v9  ;;  %v4019_v13 = vmul.u32.u64.high 3435973837, %v1011_v9, %v4018_v12 }
 0x177   :  { %v681_v15 = vmul.f32 0.05, %v679_v14  ;;  %v1012_v14 = vadd.s32 16, %v3955_v37 }
 0x179   :  { %v682_v16 = vsub.f32 %v654_v60, %v681_v15  ;;  %v683_v17 = vsub.f32 %v659_v63, %v681_v15  ;;  %v684_v18 = vsub.f32 %v664_v5, %v681_v15 }
 0x17b   :  { %v685_v19 = vmul.f32 %v682_v16, %v682_v16  ;;  %v686_v20 = vmul.f32 %v683_v17, %v683_v17  ;;  %v687_v21 = vmul.f32 %v684_v18, %v684_v18  ;;  %v1019_v17 = vshrl.u32 %v4016_v11, 3 }
 0x17c   :  { %v1030_v18 = vshrl.u32 %v4019_v13, 3 }
 0x17d   :  { %v688_v22 = vsel %vm667_vm3, %v685_v19, 0.0  ;;  %v689_v24 = vsel %vm667_vm3, %v686_v20, 0.0  ;;  %v691_v26 = vsel %vm671_vm4, %v687_v21, 0.0  ;;  %v1020_v19 = vmul.u32 10, %v1019_v17 }
 0x17e   :  { %v690_v25 = vadd.f32 %v689_v24, %v688_v22  ;;  %v1031_v20 = vmul.u32 10, %v1030_v18  ;;  %vm1077_vm4 = vcmask 123904  }
 0x17f   :  { %v1021_v22 = vsub.s32 %v3955_v37, %v1020_v19 }
 0x180   :  { %v692_v27 = vadd.f32 %v691_v26, %v690_v25  ;;  %v1032_v24 = vsub.s32 %v1011_v9, %v1031_v20 }
 0x181   :  { %vm1046_vm7 = vcmp.ne.s32.totalorder %v1021_v22, 0  ;;  %vm1049_vm8 = vcmp.lt.s32.totalorder %v1021_v22, 0 }
 0x182   :  { %v693_v28 = vrot.slane %v692_v27, 4  ;;  %vm1047_vm9 = vcmp.ne.s32.totalorder %v1032_v24, 0  ;;  %vm1050_vm10 = vcmp.lt.s32.totalorder %v1032_v24, 0  ;;  %vm1052_vm11 = vmand %vm1049_vm8, %vm1046_vm7 }
 0x183   :  { %vm1053_vm12 = vmand %vm1050_vm10, %vm1047_vm9  ;;  %vm1405_vm9 = vcmask 261120  }
 0x184   :  { %v694_v29 = vadd.f32 %v693_v28, %v692_v27 }
 0x186   :  { %v695_v30 = vrot.slane %v694_v29, 2 }
 0x188   :  { %v696_v31 = vadd.f32 %v695_v30, %v694_v29  ;;  %v1055_v29 = vadd.s32 10, %v1021_v22  ;;  %v1056_v30 = vadd.s32 10, %v1032_v24 }
 0x18a   :  { %v697_v32 = vrot.slane %v696_v31, 1 }
 0x18c   :  { %v698_v33 = vadd.f32 %v697_v32, %v696_v31 }
 0x18e   :  { %v699_v34 = vmul.f32 0.05, %v698_v33  ;;  %v4029_v33 = vsel %vm1052_vm11, %v1055_v29, %v1021_v22 }
 0x18f   :  { %vm1061_vm0 = vcmp.lt.s32.totalorder %v4029_v33, 8  ;;  %vm1397_vm8 = vcmp.lt.s32.totalorder %v4029_v33, 6  ;;  %vm1719_vm11 = vcmp.lt.s32.totalorder %v4029_v33, 4 }
 0x190   :  { %v701_v35 = vadd.f32 1e-05, %v699_v34  ;;  %v4031_v34 = vsel %vm1053_vm12, %v1056_v30, %v1032_v24  ;;  %v1113_v30 = vld [vmem:[%s4313_s6] sm:$0x1]  ;;  %vm1728_vm12 = vcmask 259072  }
 0x191   :  { %vm1062_vm1 = vcmp.lt.s32.totalorder %v4031_v34, 8  ;;  %vm1398_vm7 = vcmp.lt.s32.totalorder %v4031_v34, 6  ;;  %vm1720_vm10 = vcmp.lt.s32.totalorder %v4031_v34, 4 }
 0x192   :  { %3214 = vrsqrt.f32 %v701_v35 }
 0x19c   :  { %v3215_v40 = vpop.eup %3214 }
 0x19d   :  { %v703_v41 = vmul.f32 %v3215_v40, %v700_v38 }
 0x19f   :  { %v705_v43 = vmul.f32 %v703_v41, %v681_v15  ;;  %v711_v44 = vrot.slane %v703_v41, %v3961_v39  ;;  %v4022_v15 = vmul.u32.u64.low 3435973837, %v1012_v14  ;;  %v4023_v16 = vmul.u32.u64.high 3435973837, %v1012_v14, %v4022_v15 }
 0x1a1   :  { %v706_v45 = vsub.f32 %v704_v42, %v705_v43  ;;  %v713_v46 = vmul.f32 %v711_v44, %v654_v60  ;;  %v714_v47 = vmul.f32 %v711_v44, %v659_v63  ;;  %v715_v48 = vmul.f32 %v711_v44, %v664_v5 }
 0x1a2   :  { %v3073_v5 = vpack.c.bf16 %v2419_v4, %v2418_v3  ;;  %v1041_v21 = vshrl.u32 %v4023_v16, 3  ;;  %v2415_v43 = vsel %vm1061_vm0, 1.0, %v3249_v23 }
 0x1a3   :  { %v720_v49 = vrot.slane %v706_v45, %v3961_v39  ;;  %v2416_v45 = vsel %vm1062_vm1, 1.0, %v3249_v23 }
 0x1a4   :  { %v1042_v25 = vmul.u32 10, %v1041_v21 }
 0x1a5   :  { %v722_v50 = vadd.f32 %v720_v49, %v713_v46  ;;  %v723_v51 = vadd.f32 %v720_v49, %v714_v47  ;;  %v724_v52 = vadd.f32 %v720_v49, %v715_v48 }
 0x1a6   :  { %v1043_v28 = vsub.s32 %v1012_v14, %v1042_v25 }
 0x1a7   :  { %v725_v53 = vmax.f32 %v722_v50, 0.0  ;;  %v726_v54 = vmax.f32 %v723_v51, 0.0  ;;  %v727_v55 = vmax.f32 %v724_v52, 0.0 }
 0x1a8   :  { %vm1048_vm13 = vcmp.ne.s32.totalorder %v1043_v28, 0  ;;  %vm1051_vm14 = vcmp.lt.s32.totalorder %v1043_v28, 0  ;;  %v1057_v35 = vadd.s32 10, %v1043_v28 }
 0x1a9   :  { %2740 = vmatmul.mubr.msk.f32.vlgmr.msra.gmra.mrb[12].mxu1 %vm667_vm3, %v725_v53  ;;  %v735_v57 = vrot.slane %v725_v53, 1  ;;  %v736_v58 = vrot.slane %v726_v54, 1  ;;  %v738_v59 = vrot.slane %v727_v55, 1  ;;  %v915_v60 = vrot.slane %v725_v53, 2  ;;  %vm1054_vm15 = vmand %vm1051_vm14, %vm1048_vm13 }
 0x1aa   :  { %2749 = vmatpush3.msra.mxu1 %v2411_v56  ;;  %2742 = vmatprep.mubr.msk.f32.mxu1 %vm3250_vm2, %v3249_v23  ;;  %v916_v61 = vrot.slane %v726_v54, 2  ;;  %v918_v62 = vrot.slane %v727_v55, 2  ;;  %v1060_v42 = vsel %vm1054_vm15, %v1057_v35, %v1043_v28  ;;  %vm2046_vm13 = vcmask 1044480  }
 0x1ab   :  { %v737_v63 = vsel %vm734_vm5, %v735_v57, %v736_v58  ;;  %v739_v0 = vsel %vm734_vm5, %v736_v58, %v738_v59  ;;  %3074 = vmatprep.subr.bf16.mxu1 %v3073_v5  ;;  %vm2140_vm14 = vcmask 256000  }
 0x1ac   :  { %2729 = vmatmul.mubr.msk.f32.vlgmr.msra.gmra.mrb[18].mxu0 %vm667_vm3, %v737_v63  ;;  %v917_v1 = vsel %vm914_vm6, %v915_v60, %v916_v61  ;;  %v919_v2 = vsel %vm914_vm6, %v916_v61, %v918_v62 }
 0x1ad   :  { %2743 = vmatmul.mubr.msk.f32.gmra.mrb[14].mxu1 %vm667_vm3, %v726_v54  ;;  %2731 = vmatprep.mubr.msk.f32.mxu0 %vm3250_vm2, %v3249_v23 }
 0x1ae   :  { %2745 = vmatprep.mubr.msk.f32.mxu1 %vm3250_vm2, %v3249_v23 }
 0x1b0   :  { %2732 = vmatmul.mubr.msk.f32.gmra.mrb[20].mxu0 %vm667_vm3, %v739_v0 }
 0x1b1   :  { %2746 = vmatmul.mubr.msk.f32.gmra.mrb[16].mxu1 %vm667_vm3, %v727_v55  ;;  %2734 = vmatprep.mubr.msk.f32.mxu0 %vm3250_vm2, %v3249_v23 }
 0x1b2   :  { %2750 = vmatprep.mubr.msk.f32.mxu1 %vm3250_vm2, %v3249_v23 }
 0x1b4   :  { %2735 = vmatmul.mubr.msk.f32.gmra.mrb[22].mxu0 %vm667_vm3, %v738_v59 }
 0x1b5   :  { %2751 = vmatmul.mubr.msk.f32.vlgmr.msra.gmra.mrb[12].mxu1 %vm667_vm3, %v917_v1 }
 0x1b6   :  { %2753 = vmatprep.mubr.msk.f32.mxu1 %vm3250_vm2, %v3249_v23  ;;  %3076 = vmatpush3.bf16.msra.mxu1 %v3073_v5 }
 0x1b7   :  { %3078 = vmatprep.subr.bf16.mxu1 %v4010_v8 }
 0x1b9   :  { %2754 = vmatmul.mubr.msk.f32.gmra.mrb[14].mxu1 %vm667_vm3, %v919_v2 }
 0x1ba   :  { %2756 = vmatprep.mubr.msk.f32.mxu1 %vm3250_vm2, %v3249_v23  ;;  %vm1063_vm2 = vcmp.lt.s32.totalorder %v1060_v42, 8 }
 0x1bb   :  { %v2417_v51 = vsel %vm1063_vm2, 1.0, %v3249_v23 }
 0x1bd   :  { %2757 = vmatmul.mubr.msk.f32.gmra.mrb[16].mxu1 %vm667_vm3, %v918_v62  ;;  %vm1073_vm3 = vcmask 130048  }
 0x27f   :  { %v812_v26 = vpop.f32.mrb[18].mxu0 }
 0x280   :  { %v2730_v27 = vpop.f32.mrb[19].mxu0 }
 0x281   :  { %v1109_v27 = vld [vmem:[%s4312_s5] sm:$0x1] }
 0x283   :  { %v817_v31 = vpop.f32.mrb[20].mxu0 }
 0x284   :  { %v2733_v32 = vpop.f32.mrb[21].mxu0 }
 0x287   :  { %v822_v36 = vpop.f32.mrb[22].mxu0 }
 0x288   :  { %v2736_v37 = vpop.f32.mrb[23].mxu0  ;;  %v992_v38 = vpop.f32.mrb[12].mxu1 }
 0x289   :  { %v3181_v40 = vadd.f32 %v992_v38, %v812_v26  ;;  %v2752_v41 = vpop.f32.mrb[13].mxu1 }
 0x28b   :  { %v1070_v48 = vmul.f32 %v3181_v40, %v2415_v43 }
 0x28c   :  { %v997_v44 = vpop.f32.mrb[14].mxu1 }
 0x28d   :  { %v3182_v46 = vadd.f32 %v997_v44, %v817_v31  ;;  %v2755_v47 = vpop.f32.mrb[15].mxu1  ;;  %v1074_v55 = vsel %vm1073_vm3, %v1070_v48, 0.0 }
 0x28f   :  { %v1071_v49 = vmul.f32 %v3182_v46, %v2416_v45 }
 0x290   :  { %v1002_v50 = vpop.f32.mrb[16].mxu1 }
 0x291   :  { %v1075_v52 = vsel %vm1073_vm3, %v1071_v49, 0.0  ;;  %v3183_v53 = vadd.f32 %v1002_v50, %v822_v36  ;;  %v2758_v54 = vpop.f32.mrb[17].mxu1  ;;  %v2424_v49 = vld [vmem:[%s4314_s7 + $0x20] sm:$0xff]  ;;  %v2425_v50 = vld [vmem:[%s4314_s7 + $0x28] sm:$0xff] }
 0x292   :  { %v1076_v57 = vadd.f32 %v1075_v52, %v1074_v55  ;;  %v3081_v54 = vpack.c.bf16 %v2425_v50, %v2424_v49 }
 0x293   :  { %v1072_v56 = vmul.f32 %v3183_v53, %v2417_v51 }
 0x295   :  { %v1078_v58 = vsel %vm1077_vm4, %v1072_v56, 0.0 }
 0x296   :  { %v1079_v59 = vadd.f32 %v1078_v58, %v1076_v57 }
 0x298   :  { %v1080_v60 = vrot.slane %v1079_v59, 4 }
 0x29a   :  { %v1081_v61 = vadd.f32 %v1080_v60, %v1079_v59  ;;  %v2431_v60 = vld [vmem:[%s4317_s10 + $0x28] sm:$0xff] }
 0x29c   :  { %v1082_v62 = vrot.slane %v1081_v61, 2 }
 0x29e   :  { %v1083_v63 = vadd.f32 %v1082_v62, %v1081_v61  ;;  %v2432_v62 = vld [vmem:[%s4317_s10 + $0x30] sm:$0xff] }
 0x2a0   :  { %v1084_v0 = vrot.slane %v1083_v63, 1 }
 0x2a2   :  { %v1085_v1 = vadd.f32 %v1084_v0, %v1083_v63  ;;  %v2433_v63 = vld [vmem:[%s4317_s10 + $0x38] sm:$0xff] }
 0x2a3   :  { %v3089_v0 = vpack.c.bf16 %v2433_v63, %v2432_v62 }
 0x2a4   :  { %v1087_v2 = vmul.f32 0.0625, %v1085_v1  ;;  %v1458_v1 = vld [vmem:[%s4317_s10] sm:$0xff] }
 0x2a6   :  { %v1088_v3 = vsub.f32 %v3181_v40, %v1087_v2  ;;  %v1089_v4 = vsub.f32 %v3182_v46, %v1087_v2  ;;  %v1090_v5 = vsub.f32 %v3183_v53, %v1087_v2 }
 0x2a8   :  { %v1091_v6 = vmul.f32 %v2415_v43, %v1088_v3  ;;  %v1092_v7 = vmul.f32 %v2416_v45, %v1089_v4  ;;  %v1093_v9 = vmul.f32 %v2417_v51, %v1090_v5  ;;  %v2429_v4 = vsel %vm1398_vm7, 1.0, %v3249_v23 }
 0x2a9   :  { %v2428_v5 = vsel %vm1397_vm8, 1.0, %v3249_v23 }
 0x2aa   :  { %v1094_v10 = vmul.f32 %v1091_v6, %v1091_v6  ;;  %v1095_v11 = vmul.f32 %v1092_v7, %v1092_v7  ;;  %v1096_v12 = vmul.f32 %v1093_v9, %v1093_v9 }
 0x2ac   :  { %v1097_v13 = vsel %vm1073_vm3, %v1094_v10, 0.0  ;;  %v1098_v14 = vsel %vm1073_vm3, %v1095_v11, 0.0  ;;  %v1100_v16 = vsel %vm1077_vm4, %v1096_v12, 0.0 }
 0x2ad   :  { %v1099_v15 = vadd.f32 %v1098_v14, %v1097_v13 }
 0x2af   :  { %v1101_v17 = vadd.f32 %v1100_v16, %v1099_v15 }
 0x2b1   :  { %v1102_v18 = vrot.slane %v1101_v17, 4 }
 0x2b3   :  { %v1103_v19 = vadd.f32 %v1102_v18, %v1101_v17 }
 0x2b5   :  { %v1104_v20 = vrot.slane %v1103_v19, 2 }
 0x2b7   :  { %v1105_v21 = vadd.f32 %v1104_v20, %v1103_v19 }
 0x2b9   :  { %v1106_v22 = vrot.slane %v1105_v21, 1 }
 0x2bb   :  { %v1107_v24 = vadd.f32 %v1106_v22, %v1105_v21 }
 0x2bd   :  { %v1108_v25 = vmul.f32 0.0625, %v1107_v24 }
 0x2bf   :  { %v1110_v26 = vadd.f32 1e-05, %v1108_v25 }
 0x2c1   :  { %3216 = vrsqrt.f32 %v1110_v26 }
 0x2cb   :  { %v3217_v28 = vpop.eup %3216 }
 0x2cc   :  { %v1112_v29 = vmul.f32 %v3217_v28, %v1109_v27 }
 0x2ce   :  { %v1114_v31 = vmul.f32 %v1112_v29, %v1087_v2  ;;  %v1120_v32 = vrot.slane %v1112_v29, %v3961_v39  ;;  %v1459_v2 = vld [vmem:[%s4317_s10 + $0x8] sm:$0xff] }
 0x2cf   :  { %v4087_v3 = vpack.c.bf16 %v1459_v2, %v1458_v1  ;;  %v2439_v1 = vld [vmem:[%s4317_s10 + $0x48] sm:$0xff] }
 0x2d0   :  { %v1115_v35 = vsub.f32 %v1113_v30, %v1114_v31  ;;  %v1122_v36 = vmul.f32 %v3181_v40, %v1120_v32  ;;  %v1123_v37 = vmul.f32 %v3182_v46, %v1120_v32  ;;  %v1124_v38 = vmul.f32 %v3183_v53, %v1120_v32 }
 0x2d2   :  { %v1129_v41 = vrot.slane %v1115_v35, %v3961_v39 }
 0x2d4   :  { %v1133_v42 = vadd.f32 %v1129_v41, %v1124_v38  ;;  %v1131_v43 = vadd.f32 %v1129_v41, %v1122_v36  ;;  %v1132_v44 = vadd.f32 %v1129_v41, %v1123_v37 }
 0x2d6   :  { %v1136_v45 = vmax.f32 %v1133_v42, 0.0  ;;  %v1134_v47 = vmax.f32 %v1131_v43, 0.0  ;;  %v1135_v48 = vmax.f32 %v1132_v44, 0.0  ;;  %v1433_v43 = vld [vmem:[%s4315_s8] sm:$0x1] }
 0x2d8   :  { %v1148_v51 = vrot.slane %v1136_v45, 1  ;;  %v1145_v40 = vrot.slane %v1134_v47, 1  ;;  %v1146_v46 = vrot.slane %v1135_v48, 1  ;;  %v1311_v55 = vrot.slane %v1134_v47, 2 }
 0x2d9   :  { %v1312_v56 = vrot.slane %v1135_v48, 2  ;;  %v1314_v58 = vrot.slane %v1136_v45, 2 }
 0x2da   :  { %v1147_v52 = vsel %vm734_vm5, %v1145_v40, %v1146_v46  ;;  %v1149_v53 = vsel %vm734_vm5, %v1146_v46, %v1148_v51 }
 0x2db   :  { %2763 = vmatprep.mubr.msk.f32.mxu1 %vm1073_vm3, %v1147_v52  ;;  %v1313_v57 = vsel %vm914_vm6, %v1311_v55, %v1312_v56  ;;  %v1315_v59 = vsel %vm914_vm6, %v1312_v56, %v1314_v58  ;;  %v1460_v56 = vld [vmem:[%s4317_s10 + $0x10] sm:$0xff] }
 0x2dc   :  { %2764 = vmatmul.mubr.msk.f32.vlgmr.msra.gmra.mrb[18].mxu1 %vm1073_vm3, %v1149_v53 }
 0x2dd   :  { %3080 = vmatpush3.bf16.msra.mxu1 %v4010_v8  ;;  %2770 = vmatprep.mubr.msk.f32.mxu1 %vm1073_vm3, %v1134_v47  ;;  %v2430_v8 = vld [vmem:[%s4317_s10 + $0x20] sm:$0xff] }
 0x2de   :  { %3082 = vmatprep.subr.bf16.mxu1 %v3081_v54  ;;  %v3085_v61 = vpack.c.bf16 %v2431_v60, %v2430_v8  ;;  %v1437_v47 = vld [vmem:[%s4316_s9] sm:$0x1] }
 0x2e4   :  { %2771 = vmatmul.mubr.msk.f32.vlgmr.msra.gmra.mrb[18].mxu1 %vm1073_vm3, %v1135_v48 }
 0x2e5   :  { %3084 = vmatpush3.bf16.msra.mxu1 %v3081_v54  ;;  %2777 = vmatprep.mubr.msk.f32.mxu1 %vm1073_vm3, %v1313_v57  ;;  %v1461_v57 = vld [vmem:[%s4317_s10 + $0x18] sm:$0xff] }
 0x2e6   :  { %3086 = vmatprep.subr.bf16.mxu1 %v3085_v61  ;;  %v3097_v62 = vpack.c.bf16 %v1461_v57, %v1460_v56  ;;  %v1759_v56 = vld [vmem:[%s4319_s12] sm:$0x1] }
 0x2ec   :  { %2778 = vmatmul.mubr.msk.f32.vlgmr.msra.gmra.mrb[18].mxu1 %vm1073_vm3, %v1315_v59 }
 0x2ed   :  { %3088 = vmatpush3.bf16.msra.mxu1 %v3085_v61 }
 0x2ee   :  { %3090 = vmatprep.subr.bf16.mxu1 %v3089_v0 }
 0x2f1   :  { %3092 = vmatpush3.bf16.msra.mxu1 %v3089_v0  ;;  %v2438_v0 = vld [vmem:[%s4317_s10 + $0x40] sm:$0xff] }
 0x2f2   :  { %3094 = vmatprep.subr.bf16.mxu1 %v4087_v3  ;;  %v3101_v2 = vpack.c.bf16 %v2439_v1, %v2438_v0 }
 0x3bf   :  { %v2779_v6 = vpop.f32.mrb[18].mxu1 }
 0x3c0   :  { %v1404_v7 = vmul.f32 %v2779_v6, %v2429_v4  ;;  %v1386_v9 = vpop.f32.mrb[19].mxu1 }
 0x3c1   :  { %v1403_v10 = vmul.f32 %v2428_v5, %v1386_v9 }
 0x3c2   :  { %v1407_v11 = vsel %vm1405_vm9, %v1404_v7, 0.0  ;;  %v2447_v7 = vld [vmem:[%s4320_s13 + $0x28] sm:$0xff] }
 0x3c3   :  { %v1406_v12 = vsel %vm1405_vm9, %v1403_v10, 0.0  ;;  %v2448_v10 = vld [vmem:[%s4320_s13 + $0x30] sm:$0xff] }
 0x3c4   :  { %v1408_v13 = vadd.f32 %v1407_v11, %v1406_v12  ;;  %v2449_v11 = vld [vmem:[%s4320_s13 + $0x38] sm:$0xff] }
 0x3c5   :  { %v3113_v12 = vpack.c.bf16 %v2449_v11, %v2448_v10 }
 0x3c6   :  { %v1409_v14 = vrot.slane %v1408_v13, 4 }
 0x3c8   :  { %v1410_v15 = vadd.f32 %v1409_v14, %v1408_v13  ;;  %v1780_v13 = vld [vmem:[%s4320_s13] sm:$0xff]  ;;  %v1781_v14 = vld [vmem:[%s4320_s13 + $0x8] sm:$0xff] }
 0x3ca   :  { %v1411_v16 = vrot.slane %v1410_v15, 2 }
 0x3cc   :  { %v1412_v17 = vadd.f32 %v1411_v16, %v1410_v15  ;;  %v4151_v15 = vpack.c.bf16 %v1781_v14, %v1780_v13  ;;  %v2445_v16 = vsel %vm1720_vm10, 1.0, %v3249_v23  ;;  %v2454_v14 = vld [vmem:[%s4320_s13 + $0x40] sm:$0xff] }
 0x3ce   :  { %v1413_v18 = vrot.slane %v1412_v17, 1 }
 0x3d0   :  { %v1414_v19 = vadd.f32 %v1413_v18, %v1412_v17  ;;  %v2444_v17 = vsel %vm1719_vm11, 1.0, %v3249_v23 }
 0x3d2   :  { %v1416_v20 = vmul.f32 0.083333336, %v1414_v19 }
 0x3d4   :  { %v1417_v21 = vsub.f32 %v1386_v9, %v1416_v20  ;;  %v1418_v22 = vsub.f32 %v2779_v6, %v1416_v20 }
 0x3d6   :  { %v1419_v24 = vmul.f32 %v2428_v5, %v1417_v21  ;;  %v1420_v25 = vmul.f32 %v2429_v4, %v1418_v22  ;;  %v2440_v4 = vld [vmem:[%s4317_s10 + $0x50] sm:$0xff]  ;;  %v2441_v5 = vld [vmem:[%s4317_s10 + $0x58] sm:$0xff] }
 0x3d8   :  { %v1421_v26 = vmul.f32 %v1419_v24, %v1419_v24  ;;  %v1422_v27 = vmul.f32 %v1420_v25, %v1420_v25 }
 0x3da   :  { %v1423_v28 = vsel %vm1405_vm9, %v1421_v26, 0.0  ;;  %v1424_v29 = vsel %vm1405_vm9, %v1422_v27, 0.0 }
 0x3db   :  { %v1425_v30 = vadd.f32 %v1424_v29, %v1423_v28 }
 0x3dd   :  { %v1426_v31 = vrot.slane %v1425_v30, 4 }
 0x3df   :  { %v1427_v32 = vadd.f32 %v1426_v31, %v1425_v30 }
 0x3e1   :  { %v1428_v35 = vrot.slane %v1427_v32, 2 }
 0x3e3   :  { %v1429_v36 = vadd.f32 %v1428_v35, %v1427_v32 }
 0x3e5   :  { %v1430_v37 = vrot.slane %v1429_v36, 1 }
 0x3e7   :  { %v1431_v38 = vadd.f32 %v1430_v37, %v1429_v36 }
 0x3e9   :  { %v1432_v41 = vmul.f32 0.083333336, %v1431_v38 }
 0x3eb   :  { %v1434_v42 = vadd.f32 1e-05, %v1432_v41 }
 0x3ed   :  { %3218 = vrsqrt.f32 %v1434_v42 }
 0x3f7   :  { %v3219_v44 = vpop.eup %3218 }
 0x3f8   :  { %v1436_v45 = vmul.f32 %v3219_v44, %v1433_v43 }
 0x3fa   :  { %v1438_v48 = vmul.f32 %v1436_v45, %v1416_v20  ;;  %v1444_v49 = vrot.slane %v1436_v45, %v3961_v39 }
 0x3fc   :  { %v1439_v50 = vsub.f32 %v1437_v47, %v1438_v48  ;;  %v1446_v51 = vmul.f32 %v1444_v49, %v1386_v9  ;;  %v1447_v40 = vmul.f32 %v2779_v6, %v1444_v49  ;;  %v3105_v6 = vpack.c.bf16 %v2441_v5, %v2440_v4  ;;  %v1783_v4 = vld [vmem:[%s4320_s13 + $0x18] sm:$0xff] }
 0x3fe   :  { %v1452_v46 = vrot.slane %v1439_v50, %v3961_v39 }
 0x400   :  { %v1454_v52 = vadd.f32 %v1452_v46, %v1446_v51  ;;  %v1455_v53 = vadd.f32 %v1452_v46, %v1447_v40 }
 0x402   :  { %v1456_v54 = vmax.f32 %v1454_v52, 0.0  ;;  %v1457_v55 = vmax.f32 %v1455_v53, 0.0  ;;  %v1755_v53 = vld [vmem:[%s4318_s11] sm:$0x1] }
 0x404   :  { %v1469_v58 = vrot.slane %v1456_v54, 1  ;;  %v1470_v59 = vrot.slane %v1457_v55, 1  ;;  %v1635_v8 = vrot.slane %v1456_v54, 2  ;;  %v1636_v60 = vrot.slane %v1457_v55, 2 }
 0x406   :  { %v1471_v61 = vsel %vm734_vm5, %v1469_v58, %v1470_v59  ;;  %v1637_v63 = vsel %vm914_vm6, %v1635_v8, %v1636_v60 }
 0x407   :  { %2788 = vmatprep.mubr.msk.f32.mxu1 %vm1405_vm9, %v1471_v61 }
 0x408   :  { %2789 = vmatmul.mubr.msk.f32.vlgmr.msra.gmra.mrb[20].mxu1 %vm1405_vm9, %v1470_v59 }
 0x409   :  { %3096 = vmatpush3.bf16.msra.mxu1 %v4087_v3  ;;  %2799 = vmatprep.mubr.msk.f32.mxu1 %vm1405_vm9, %v1456_v54  ;;  %v2446_v3 = vld [vmem:[%s4320_s13 + $0x20] sm:$0xff] }
 0x40a   :  { %3098 = vmatprep.subr.bf16.mxu1 %v3097_v62  ;;  %v3109_v9 = vpack.c.bf16 %v2447_v7, %v2446_v3 }
 0x40c   :  { %3110 = vmatprep.subr.bf16.mxu0 %v3109_v9 }
 0x40d   :  { %3100 = vmatpush3.bf16.msra.mxu1 %v3097_v62  ;;  %3112 = vmatpush3.bf16.msra.mxu0 %v3109_v9 }
 0x40e   :  { %3102 = vmatprep.subr.bf16.mxu1 %v3101_v2  ;;  %3114 = vmatprep.subr.bf16.mxu0 %v3113_v12 }
 0x410   :  { %2800 = vmatmul.mubr.msk.f32.vlgmr.msra.gmra.mrb[20].mxu1 %vm1405_vm9, %v1457_v55 }
 0x411   :  { %3104 = vmatpush3.bf16.msra.mxu1 %v3101_v2  ;;  %2810 = vmatprep.mubr.msk.f32.mxu1 %vm1405_vm9, %v1637_v63  ;;  %v1782_v2 = vld [vmem:[%s4320_s13 + $0x10] sm:$0xff] }
 0x412   :  { %3106 = vmatprep.subr.bf16.mxu1 %v3105_v6  ;;  %3116 = vmatpush3.bf16.msra.mxu0 %v3113_v12  ;;  %v3121_v12 = vpack.c.bf16 %v1783_v4, %v1782_v2 }
 0x413   :  { %3118 = vmatprep.subr.bf16.mxu0 %v4151_v15 }
 0x415   :  { %3108 = vmatpush3.bf16.msra.mxu1 %v3105_v6 }
 0x418   :  { %2811 = vmatmul.mubr.msk.f32.vlgmr.msra.gmra.mrb[20].mxu1 %vm1405_vm9, %v1636_v60 }
 0x4eb   :  { %v2812_v18 = vpop.f32.mrb[20].mxu1 }
 0x4ec   :  { %v1726_v19 = vmul.f32 %v2812_v18, %v2445_v16  ;;  %v1708_v20 = vpop.f32.mrb[21].mxu1 }
 0x4ed   :  { %v1725_v21 = vmul.f32 %v2444_v17, %v1708_v20 }
 0x4ee   :  { %v1729_v22 = vsel %vm1728_vm12, %v1726_v19, 0.0  ;;  %v2456_v19 = vld [vmem:[%s4320_s13 + $0x50] sm:$0xff] }
 0x4ef   :  { %v1727_v24 = vsel %vm1405_vm9, %v1725_v21, 0.0 }
 0x4f0   :  { %v1730_v25 = vadd.f32 %v1729_v22, %v1727_v24  ;;  %v2460_v22 = vld [vmem:[%s4320_s13 + $0x60] sm:$0xff] }
 0x4f2   :  { %v1731_v26 = vrot.slane %v1730_v25, 4 }
 0x4f4   :  { %v1732_v27 = vadd.f32 %v1731_v26, %v1730_v25  ;;  %v2462_v25 = vld [vmem:[%s4320_s13 + $0x70] sm:$0xff]  ;;  %v2463_v26 = vld [vmem:[%s4320_s13 + $0x78] sm:$0xff] }
 0x4f6   :  { %v1733_v28 = vrot.slane %v1732_v27, 2 }
 0x4f8   :  { %v1734_v29 = vadd.f32 %v1733_v28, %v1732_v27  ;;  %v3137_v27 = vpack.c.bf16 %v2463_v26, %v2462_v25  ;;  %v2192_v28 = vld [vmem:[%s4323_s16] sm:$0xff]  ;;  %v2292_v26 = vld [vmem:[%s4325_s18 + $0x30] sm:$0xff] }
 0x4fa   :  { %v1735_v30 = vrot.slane %v1734_v29, 1 }
 0x4fc   :  { %v1736_v31 = vadd.f32 %v1735_v30, %v1734_v29  ;;  %v2193_v29 = vld [vmem:[%s4323_s16 + $0x8] sm:$0xff] }
 0x4fd   :  { %v3141_v30 = vpack.c.bf16 %v2193_v29, %v2192_v28  ;;  %v2294_v29 = vld [vmem:[%s4325_s18 + $0x40] sm:$0xff] }
 0x4fe   :  { %v1738_v32 = vmul.f32 0.125, %v1736_v31  ;;  %v2194_v31 = vld [vmem:[%s4323_s16 + $0x10] sm:$0xff] }
 0x4ff   :  { %3142 = vmatprep.subr.bf16.mxu1 %v3141_v30 }
 0x500   :  { %v1739_v35 = vsub.f32 %v1708_v20, %v1738_v32  ;;  %v1740_v36 = vsub.f32 %v2812_v18, %v1738_v32  ;;  %3144 = vmatpush3.bf16.msra.mxu1 %v3141_v30  ;;  %v2295_v30 = vld [vmem:[%s4325_s18 + $0x48] sm:$0xff] }
 0x502   :  { %v1741_v37 = vmul.f32 %v2444_v17, %v1739_v35  ;;  %v1742_v38 = vmul.f32 %v2445_v16, %v1740_v36  ;;  %v2455_v16 = vld [vmem:[%s4320_s13 + $0x48] sm:$0xff]  ;;  %v2286_v36 = vld [vmem:[%s4325_s18] sm:$0xff] }
 0x504   :  { %v1743_v41 = vmul.f32 %v1741_v37, %v1741_v37  ;;  %v1744_v42 = vmul.f32 %v1742_v38, %v1742_v38  ;;  %v2287_v37 = vld [vmem:[%s4325_s18 + $0x8] sm:$0xff] }
 0x505   :  { %v3149_v38 = vpack.c.bf16 %v2287_v37, %v2286_v36  ;;  %v2298_v37 = vld [vmem:[%s4325_s18 + $0x60] sm:$0xff] }
 0x506   :  { %v1745_v43 = vsel %vm1405_vm9, %v1743_v41, 0.0  ;;  %v1746_v44 = vsel %vm1728_vm12, %v1744_v42, 0.0 }
 0x507   :  { %v1747_v45 = vadd.f32 %v1746_v44, %v1745_v43 }
 0x509   :  { %v1748_v47 = vrot.slane %v1747_v45, 4 }
 0x50b   :  { %v1749_v48 = vadd.f32 %v1748_v47, %v1747_v45 }
 0x50d   :  { %v1750_v49 = vrot.slane %v1749_v48, 2 }
 0x50f   :  { %v1751_v50 = vadd.f32 %v1750_v49, %v1749_v48 }
 0x511   :  { %v1752_v51 = vrot.slane %v1751_v50, 1 }
 0x513   :  { %v1753_v40 = vadd.f32 %v1752_v51, %v1751_v50 }
 0x515   :  { %v1754_v46 = vmul.f32 0.125, %v1753_v40 }
 0x517   :  { %v1756_v52 = vadd.f32 1e-05, %v1754_v46 }
 0x519   :  { %3220 = vrsqrt.f32 %v1756_v52 }
 0x523   :  { %v3221_v54 = vpop.eup %3220 }
 0x524   :  { %v1758_v55 = vmul.f32 %v3221_v54, %v1755_v53 }
 0x526   :  { %v1760_v57 = vmul.f32 %v1758_v55, %v1738_v32  ;;  %v1766_v58 = vrot.slane %v1758_v55, %v3961_v39  ;;  %v2195_v32 = vld [vmem:[%s4323_s16 + $0x18] sm:$0xff] }
 0x527   :  { %v3145_v35 = vpack.c.bf16 %v2195_v32, %v2194_v31  ;;  %v3165_v31 = vpack.c.bf16 %v2295_v30, %v2294_v29  ;;  %v2296_v32 = vld [vmem:[%s4325_s18 + $0x50] sm:$0xff] }
 0x528   :  { %v1761_v59 = vsub.f32 %v1759_v56, %v1760_v57  ;;  %v1768_v8 = vmul.f32 %v1766_v58, %v1708_v20  ;;  %v1769_v60 = vmul.f32 %v2812_v18, %v1766_v58  ;;  %v3125_v18 = vpack.c.bf16 %v2455_v16, %v2454_v14  ;;  %v2457_v20 = vld [vmem:[%s4320_s13 + $0x58] sm:$0xff] }
 0x529   :  { %v3129_v21 = vpack.c.bf16 %v2457_v20, %v2456_v19  ;;  %3146 = vmatprep.subr.bf16.mxu1 %v3145_v35  ;;  %v2288_v19 = vld [vmem:[%s4325_s18 + $0x10] sm:$0xff]  ;;  %v2289_v20 = vld [vmem:[%s4325_s18 + $0x18] sm:$0xff] }
 0x52a   :  { %v1774_v61 = vrot.slane %v1761_v59, %v3961_v39  ;;  %3148 = vmatpush3.bf16.msra.mxu1 %v3145_v35  ;;  %v2297_v35 = vld [vmem:[%s4325_s18 + $0x58] sm:$0xff] }
 0x52b   :  { %3150 = vmatprep.subr.bf16.mxu1 %v3149_v38  ;;  %v3169_v36 = vpack.c.bf16 %v2297_v35, %v2296_v32 }
 0x52c   :  { %v1776_v62 = vadd.f32 %v1774_v61, %v1768_v8  ;;  %v1777_v63 = vadd.f32 %v1774_v61, %v1769_v60 }
 0x52e   :  { %v1778_v0 = vmax.f32 %v1776_v62, 0.0  ;;  %v1779_v1 = vmax.f32 %v1777_v63, 0.0 }
 0x530   :  { %v1791_v5 = vrot.slane %v1778_v0, 1  ;;  %v1792_v6 = vrot.slane %v1779_v1, 1  ;;  %v1957_v3 = vrot.slane %v1778_v0, 2  ;;  %v1958_v7 = vrot.slane %v1779_v1, 2 }
 0x531   :  { %v2047_v9 = vrot.slane %v1778_v0, 3  ;;  %v2048_v10 = vrot.slane %v1779_v1, 3 }
 0x532   :  { %v1793_v11 = vsel %vm734_vm5, %v1791_v5, %v1792_v6  ;;  %v1959_v13 = vsel %vm914_vm6, %v1957_v3, %v1958_v7  ;;  %vm2132_vm5 = vcmp.lt.s32.totalorder %v4031_v34, 1  ;;  %vm2131_vm6 = vcmp.lt.s32.totalorder %v4029_v33, 1 }
 0x533   :  { %2821 = vmatprep.mubr.msk.f32.mxu0 %vm1405_vm9, %v1793_v11  ;;  %v2049_v17 = vsel %vm2046_vm13, %v2047_v9, %v2048_v10  ;;  %v2467_v41 = vsel %vm2132_vm5, 1.0, %v3249_v23  ;;  %v2466_v42 = vsel %vm2131_vm6, 1.0, %v3249_v23  ;;  %v2171_v9 = vld [vmem:[%s4322_s15] sm:$0x1] }
 0x534   :  { %2822 = vmatmul.mubr.msk.f32.vlgmr.msra.gmra.mrb[24].mxu0 %vm1405_vm9, %v1792_v6  ;;  %v2167_v6 = vld [vmem:[%s4321_s14] sm:$0x1] }
 0x535   :  { %3120 = vmatpush3.bf16.msra.mxu0 %v4151_v15  ;;  %2832 = vmatprep.mubr.msk.f32.mxu0 %vm1405_vm9, %v1778_v0  ;;  %v2461_v15 = vld [vmem:[%s4320_s13 + $0x68] sm:$0xff] }
 0x536   :  { %3122 = vmatprep.subr.bf16.mxu0 %v3121_v12  ;;  %v3133_v24 = vpack.c.bf16 %v2461_v15, %v2460_v22  ;;  %v3153_v15 = vpack.c.bf16 %v2289_v20, %v2288_v19 }
 0x539   :  { %3124 = vmatpush3.bf16.msra.mxu0 %v3121_v12 }
 0x53a   :  { %3126 = vmatprep.subr.bf16.mxu0 %v3125_v18 }
 0x53c   :  { %2833 = vmatmul.mubr.msk.f32.vlgmr.msra.gmra.mrb[24].mxu0 %vm1405_vm9, %v1779_v1 }
 0x53d   :  { %3128 = vmatpush3.bf16.msra.mxu0 %v3125_v18  ;;  %2843 = vmatprep.mubr.msk.f32.mxu0 %vm1405_vm9, %v1959_v13 }
 0x53e   :  { %3130 = vmatprep.subr.bf16.mxu0 %v3129_v21 }
 0x541   :  { %3132 = vmatpush3.bf16.msra.mxu0 %v3129_v21 }
 0x542   :  { %3134 = vmatprep.subr.bf16.mxu0 %v3133_v24 }
 0x544   :  { %2844 = vmatmul.mubr.msk.f32.vlgmr.msra.gmra.mrb[24].mxu0 %vm1405_vm9, %v1958_v7 }
 0x545   :  { %3136 = vmatpush3.bf16.msra.mxu0 %v3133_v24  ;;  %2854 = vmatprep.mubr.msk.f32.mxu0 %vm1405_vm9, %v2049_v17  ;;  %v2290_v24 = vld [vmem:[%s4325_s18 + $0x20] sm:$0xff] }
 0x546   :  { %3138 = vmatprep.subr.bf16.mxu0 %v3137_v27 }
 0x549   :  { %3140 = vmatpush3.bf16.msra.mxu0 %v3137_v27  ;;  %v2293_v27 = vld [vmem:[%s4325_s18 + $0x38] sm:$0xff] }
 0x54a   :  { %v3161_v28 = vpack.c.bf16 %v2293_v27, %v2292_v26 }
 0x54c   :  { %2855 = vmatmul.mubr.msk.f32.vlgmr.msra.gmra.mrb[24].mxu0 %vm1405_vm9, %v2048_v10 }
 0x61f   :  { %v2856_v43 = vpop.f32.mrb[24].mxu0 }
 0x620   :  { %v2138_v44 = vmul.f32 %v2856_v43, %v2467_v41  ;;  %v2120_v45 = vpop.f32.mrb[25].mxu0 }
 0x621   :  { %v2137_v47 = vmul.f32 %v2466_v42, %v2120_v45 }
 0x622   :  { %v2141_v48 = vsel %vm2140_vm14, %v2138_v44, 0.0 }
 0x623   :  { %v2139_v49 = vsel %vm1405_vm9, %v2137_v47, 0.0 }
 0x624   :  { %v2142_v50 = vadd.f32 %v2141_v48, %v2139_v49 }
 0x626   :  { %v2143_v51 = vrot.slane %v2142_v50, 4 }
 0x628   :  { %v2144_v40 = vadd.f32 %v2143_v51, %v2142_v50 }
 0x62a   :  { %v2145_v46 = vrot.slane %v2144_v40, 2 }
 0x62c   :  { %v2146_v34 = vadd.f32 %v2145_v46, %v2144_v40  ;;  %v2471_v46 = vld [vmem:[%s4326_s19] ss:$0 sm:$0xff] }
 0x62e   :  { %v2147_v52 = vrot.slane %v2146_v34, 1 }
 0x630   :  { %v2148_v33 = vadd.f32 %v2147_v52, %v2146_v34 }
 0x632   :  { %v2150_v53 = vmul.f32 0.5, %v2148_v33 }
 0x634   :  { %v2151_v54 = vsub.f32 %v2120_v45, %v2150_v53  ;;  %v2152_v55 = vsub.f32 %v2856_v43, %v2150_v53 }
 0x636   :  { %v2153_v23 = vmul.f32 %v2466_v42, %v2151_v54  ;;  %v2154_v56 = vmul.f32 %v2467_v41, %v2152_v55  ;;  %v2300_v42 = vld [vmem:[%s4325_s18 + $0x70] sm:$0xff] }
 0x638   :  { %v2155_v57 = vmul.f32 %v2153_v23, %v2153_v23  ;;  %v2156_v58 = vmul.f32 %v2154_v56, %v2154_v56 }
 0x63a   :  { %v2157_v59 = vsel %vm1405_vm9, %v2155_v57, 0.0  ;;  %v2158_v8 = vsel %vm2140_vm14, %v2156_v58, 0.0 }
 0x63b   :  { %v2159_v60 = vadd.f32 %v2158_v8, %v2157_v59 }
 0x63d   :  { %v2160_v61 = vrot.slane %v2159_v60, 4 }
 0x63f   :  { %v2161_v62 = vadd.f32 %v2160_v61, %v2159_v60 }
 0x641   :  { %v2162_v63 = vrot.slane %v2161_v62, 2 }
 0x643   :  { %v2163_v0 = vadd.f32 %v2162_v63, %v2161_v62 }
 0x645   :  { %v2164_v1 = vrot.slane %v2163_v0, 1 }
 0x647   :  { %v2165_v2 = vadd.f32 %v2164_v1, %v2163_v0 }
 0x649   :  { %v2166_v4 = vmul.f32 0.5, %v2165_v2 }
 0x64b   :  { %v2168_v5 = vadd.f32 1e-05, %v2166_v4 }
 0x64d   :  { %3222 = vrsqrt.f32 %v2168_v5 }
 0x657   :  { %v3223_v3 = vpop.eup %3222 }
 0x658   :  { %v2170_v7 = vmul.f32 %v3223_v3, %v2167_v6 }
 0x65a   :  { %v2172_v10 = vmul.f32 %v2170_v7, %v2150_v53  ;;  %v2178_v11 = vrot.slane %v2170_v7, %v3961_v39 }
 0x65c   :  { %v2173_v12 = vsub.f32 %v2171_v9, %v2172_v10  ;;  %v2180_v13 = vmul.f32 %v2178_v11, %v2120_v45  ;;  %v2181_v14 = vmul.f32 %v2856_v43, %v2178_v11  ;;  %v2301_v43 = vld [vmem:[%s4325_s18 + $0x78] sm:$0xff]  ;;  %v2468_v45 = vld [vmem:[%s4324_s17] ss:$0 sm:$0xff] }
 0x65d   :  { %v3177_v44 = vpack.c.bf16 %v2301_v43, %v2300_v42 }
 0x65e   :  { %v2186_v16 = vrot.slane %v2173_v12, %v3961_v39  ;;  %v2291_v39 = vld [vmem:[%s4325_s18 + $0x28] sm:$0xff] }
 0x65f   :  { %v3157_v25 = vpack.c.bf16 %v2291_v39, %v2290_v24 }
 0x660   :  { %v2188_v17 = vadd.f32 %v2186_v16, %v2180_v13  ;;  %v2189_v18 = vadd.f32 %v2186_v16, %v2181_v14 }
 0x662   :  { %v2190_v21 = vmax.f32 %v2188_v17, 0.0  ;;  %v2191_v22 = vmax.f32 %v2189_v18, 0.0 }
 0x664   :  { %2865 = vmatprep.mubr.msk.f32.mxu1 %vm1405_vm9, %v2190_v21 }
 0x665   :  { %2866 = vmatmul.mubr.msk.f32.vlgmr.msra.gmra.mrb[22].mxu1 %vm1405_vm9, %v2191_v22 }
 0x666   :  { %3152 = vmatpush3.bf16.msra.mxu1 %v3149_v38  ;;  %v2299_v38 = vld [vmem:[%s4325_s18 + $0x68] sm:$0xff]  ;;  %s3251_s18 = smov [#allocation2]  }
 0x667   :  { %3154 = vmatprep.subr.bf16.mxu1 %v3153_v15  ;;  %v3173_v41 = vpack.c.bf16 %v2299_v38, %v2298_v37  ;;  %s2392_s5 = sshll.u32 %s3251_s18, 4  ;;  %s2393_s5 = int_to_ptr.vmem [resolvable:$true] %s2392_s5 }
 0x668   :  { %s3224_s17 = scalar_lea.vmem %s2393_s5, 32  ;;  %p3229_p1 = scmp.lt.s32.totalorder %s2393_s5, %s2393_s5 }
 0x669   :  { %p3225_p0 = scmp.ne.s32.totalorder %s2393_s5, %s3224_s17  ;;  %p3230_p2 = scmp.lt.s32.totalorder %s3224_s17, %s3224_s17 }
 0x66a   :  { %3156 = vmatpush3.bf16.msra.mxu1 %v3153_v15 }
 0x66b   :  { %3158 = vmatprep.subr.bf16.mxu1 %v3157_v25  ;;  %p3231_p3 = por %p3230_p2, %p3229_p1 }
 0x66d   :  { %p3232_p4 = pnand %p3231_p3, %p3225_p0 }
 0x66e   :  { %3160 = vmatpush3.bf16.msra.mxu1 %v3157_v25 }
 0x66f   :  { %3162 = vmatprep.subr.bf16.mxu1 %v3161_v28 }
 0x672   :  { %3164 = vmatpush3.bf16.msra.mxu1 %v3161_v28 }
 0x673   :  { %3166 = vmatprep.subr.bf16.mxu1 %v3165_v31 }
 0x676   :  { %3168 = vmatpush3.bf16.msra.mxu1 %v3165_v31 }
 0x677   :  { %3170 = vmatprep.subr.bf16.mxu1 %v3169_v36 }
 0x67a   :  { %3172 = vmatpush3.bf16.msra.mxu1 %v3169_v36 }
 0x67b   :  { %3174 = vmatprep.subr.bf16.mxu1 %v3173_v41 }
 0x67e   :  { %3176 = vmatpush3.bf16.msra.mxu1 %v3173_v41 }
 0x67f   :  { %3178 = vmatprep.subr.bf16.mxu1 %v3177_v44 }
 0x682   :  { %3180 = vmatpush3.bf16.msra.mxu1 %v3177_v44 }
 0x738   :  { %v2867_v47 = vpop.f32.mrb[22].mxu1 }
 0x739   :  { %v2281_v48 = vadd.f32 %v2867_v47, %v2468_v45  ;;  %v2275_v49 = vpop.f32.mrb[23].mxu1 }
 0x73a   :  { %v2276_v50 = vadd.f32 %v2468_v45, %v2275_v49 }
 0x73b   :  { %v2285_v40 = vmax.f32 %v2281_v48, 0.0 }
 0x73c   :  { %v2284_v51 = vmax.f32 %v2276_v50, 0.0 }
 0x73e   :  { %2900 = vmatprep.mubr.f32.mxu1 %v2284_v51 }
 0x73f   :  { %2901 = vmatmul.mubr.f32.vlgmr.msra.gmra.mrb[24].mxu1 %v2285_v40 }
 0x812   :  { %v2902_v34 = vpop.f32.mrb[24].mxu1 }
 0x813   :  { %v2381_v52 = vadd.f32 %v2902_v34, %v2471_v46  ;;  %v2375_v33 = vpop.f32.mrb[25].mxu1 }
 0x814   :  { %v2376_v53 = vadd.f32 %v2471_v46, %v2375_v33 }
 0x815   :  { %2385 = vst [vmem:[#allocation2 - $0x1] sm:$0x4] %v2381_v52 }
 0x816   :  { %2384 = vst [vmem:[#allocation2] sm:$0x1] %v2376_v53 }
 0x817   :  { %3235 = shalt.err (!%p3232_p4)
}
 0x818   :  { %s3236_s19 = scalar_lea.hbm %s4327_s20, 32 }
 0x819   :  { %p3237_p5 = scmp.ne.s32.totalorder %s4327_s20, %s3236_s19  ;;  %p3240_p6 = scmp.lt.u32.totalorder %s3236_s19, %s4327_s20 }
 0x81b   :  { %p3242_p7 = pnand %p3240_p6, %p3237_p5 }
 0x81d   :  { %3245 = shalt.err (!%p3242_p7)
}
 0x81e   :  { %2395 = dma.vmem_to_hbm [thread:$0]  %s2393_s5, 32, %s4327_s20, [#allocation3]  }
 0x81f   :  { %3246 = dma.done.wait [#allocation3], 32  }
 0x820   :  { %3247 = vsyncadd [#allocation3], 4294967264 }
 0x821   :  { %2399 = vsyncpa [#allocation3], 1 }

</bundles_post_ra>
